<compile_context>
chip_gen: v7x
topology: tpu7x:2x2x1
jax: 0.10.0
libtpu: 0.0.40
codegen_flags: <defaults>
</compile_context>

<pallas_src>
import math
from functools import partial

import jax
import jax.numpy as jnp
from jax.experimental import pallas as pl
from jax.experimental.pallas import tpu as pltpu


def mha_kernel(x_ref, wq_ref, bq_ref, wk_ref, bk_ref, wv_ref, bv_ref,
               wo_ref, bo_ref, o_ref, q_scr, k_scr, v_scr, out_scr,
               *, num_heads, d_k, compute_dtype):
    scale = 1.0 / math.sqrt(float(d_k))

    x = x_ref[0].astype(compute_dtype)                     # (S, D) bf16 MXU input

    # Lane-dense projections (N = D): full MXU tiles on the 256-wide v6e/v7x arrays
    # (and 128-wide v5e).  f32 accumulation and bias adds; scale folded into Q
    # (O(S*D) VPU work, not O(S^2) per head on the score matrix).
    q = (jnp.dot(x, wq_ref[...], preferred_element_type=jnp.float32)
         + bq_ref[...]) * scale
    k = jnp.dot(x, wk_ref[...], preferred_element_type=jnp.float32) + bk_ref[...]
    v = jnp.dot(x, wv_ref[...], preferred_element_type=jnp.float32) + bv_ref[...]

    # One-time head-major relayout into VMEM scratch (static lane slices only), so the
    # streaming head loop below does nothing but cheap dynamic leading-axis indexing.
    for h in range(num_heads):
        lo = h * d_k
        q_scr[h] = q[:, lo:lo + d_k].astype(compute_dtype)
        k_scr[h] = k[:, lo:lo + d_k].astype(compute_dtype)
        v_scr[h] = v[:, lo:lo + d_k].astype(compute_dtype)

    out_scr[...] = jnp.zeros_like(out_scr)

    # Per-head streaming attention.  Only one (S,S) score/prob block is live at a
    # time (1/H the peak VMEM of the stacked version), the head merge is folded into
    # the W_o accumulation, and lax.fori_loop bounds live ranges (a static unroll
    # would keep every head's intermediates live simultaneously).
    def head_body(h, carry):
        qh = q_scr[h]                                       # (S, d_k) bf16
        kh = k_scr[h]
        vh = v_scr[h]
        # q @ k^T via contraction on the last dim of both operands (no source-level
        # transpose of K).
        s = jax.lax.dot_general(qh, kh, (((1,), (1,)), ((), ())),
                                preferred_element_type=jnp.float32)   # (S, S) f32
        s = s - jnp.max(s, axis=-1, keepdims=True)                    # stable softmax
        p = jnp.exp(s)
        l = jnp.sum(p, axis=-1, keepdims=True)                        # (S, 1) f32
        ctx = jnp.dot(p.astype(compute_dtype), vh,
                      preferred_element_type=jnp.float32)             # (S, d_k) f32
        # Normalize AFTER the PV matmul: O(S*d_k) multiplies, reciprocal on the EUP.
        ctx = ctx * pl.reciprocal(l, approx=True)
        out_scr[...] += jnp.dot(ctx.astype(compute_dtype), wo_ref[h],
                                preferred_element_type=jnp.float32)
        return carry

    jax.lax.fori_loop(0, num_heads, head_body, 0)

    o_ref[0] = (out_scr[...] + bo_ref[...]).astype(o_ref.dtype)


def _vmem_budget_bytes():
    # ~80% of physical VMEM per generation (leave headroom for the double-buffered
    # x/out blocks and compiler-internal scratch): ~51 MiB on v7x (64 MiB physical),
    # ~102 MiB on v5e/v6e (128 MiB physical).
    try:
        cap = pltpu.get_tpu_info().vmem_capacity_bytes
        if cap:
            return int(cap * 0.8)
    except Exception:
        pass
    return 48 * 1024 * 1024


def _const_spec(shape, single_buffer):
    index_map = lambda b, _n=len(shape): (0,) * _n
    if single_buffer:
        # Grid-invariant operand: one VMEM buffer is enough; the default double
        # buffer would be pure VMEM waste.
        return pl.BlockSpec(shape, index_map, pipeline_mode=pl.Buffered(1))
    return pl.BlockSpec(shape, index_map)


def _build_mha_call(*, B, S, D, H, d_k, out_dtype, compute_dtype,
                    vmem_limit, single_buffer_weights):
    kernel = partial(mha_kernel, num_heads=H, d_k=d_k, compute_dtype=compute_dtype)

    x_spec = pl.BlockSpec((1, S, D), lambda b: (b, 0, 0))
    out_spec = pl.BlockSpec((1, S, D), lambda b: (b, 0, 0))
    sb = single_buffer_weights
    in_specs = [
        x_spec,
        _const_spec((D, D), sb), _const_spec((1, D), sb),        # W_q, b_q
        _const_spec((D, D), sb), _const_spec((1, D), sb),        # W_k, b_k
        _const_spec((D, D), sb), _const_spec((1, D), sb),        # W_v, b_v
        _const_spec((H, d_k, D), sb), _const_spec((1, D), sb),   # W_o (head-major), b_o
    ]

    return pl.pallas_call(
        kernel,
        out_shape=jax.ShapeDtypeStruct((B, S, D), out_dtype),
        grid_spec=pltpu.PrefetchScalarGridSpec(
            num_scalar_prefetch=0,
            grid=(B,),
            in_specs=in_specs,
            out_specs=out_spec,
            scratch_shapes=[
                pltpu.VMEM((H, S, d_k), compute_dtype),   # Q heads
                pltpu.VMEM((H, S, d_k), compute_dtype),   # K heads
                pltpu.VMEM((H, S, d_k), compute_dtype),   # V heads
                pltpu.VMEM((S, D), jnp.float32),          # output accumulator
            ],
        ),
        compiler_params=pltpu.CompilerParams(
            dimension_semantics=("parallel",),
            vmem_limit_bytes=vmem_limit,
        ),
    )


def multi_head_attention(x, params, *, num_heads, compute_dtype=jnp.bfloat16):
    """x: (B, S, D) float32. params: weights (D, D) stored (in, out); biases (1, D)."""
    B, S, D = x.shape
    assert D % num_heads == 0, "d_model must be divisible by num_heads"
    H, d_k = num_heads, D // num_heads

    # One-time parameter prep (plain XLA, outside the kernel): bf16 MXU weights,
    # W_o split per head along its rows so the head merge folds into accumulation.
    wq = params["wq"].astype(compute_dtype)
    wk = params["wk"].astype(compute_dtype)
    wv = params["wv"].astype(compute_dtype)
    wo_h = params["wo"].reshape(H, d_k, D).astype(compute_dtype)
    bq, bk, bv, bo = params["bq"], params["bk"], params["bv"], params["bo"]   # f32

    args = (x, wq, bq, wk, bk, wv, bv, wo_h, bo)
    vmem_limit = _vmem_budget_bytes()
    common = dict(B=B, S=S, D=D, H=H, d_k=d_k, out_dtype=x.dtype,
                  compute_dtype=compute_dtype, vmem_limit=vmem_limit)

    try:
        fn = _build_mha_call(single_buffer_weights=True, **common)
        return fn(*args)
    except Exception:
        # Fallback if this jax/Mosaic build rejects pipeline_mode=pl.Buffered(1);
        # a genuine kernel error would re-raise from this path too.
        fn = _build_mha_call(single_buffer_weights=False, **common)
        return fn(*args)


def reference_mha(x, params, *, num_heads):
    """Plain-JAX f32 reference mirroring the PyTorch forward."""
    B, S, D = x.shape
    d_k = D // num_heads

    def proj(w, b):
        return x @ w + b                                # (B, S, D)

    def split(t):                                       # (B, S, D) -> (B, H, S, d_k)
        return t.reshape(B, S, num_heads, d_k).transpose(0, 2, 1, 3)

    q = split(proj(params["wq"], params["bq"]))
    k = split(proj(params["wk"], params["bk"]))
    v = split(proj(params["wv"], params["bv"]))

    scores = jnp.einsum("bhqd,bhkd->bhqk", q, k) / jnp.sqrt(jnp.float32(d_k))
    attn = jax.nn.softmax(scores, axis=-1)
    ctx = jnp.einsum("bhqk,bhkd->bhqd", attn, v)
    ctx = ctx.transpose(0, 2, 1, 3).reshape(B, S, D)
    return ctx @ params["wo"] + params["bo"]


if __name__ == "__main__":
    B, S, D, H = 2, 8, 32, 4     # batch, seq, d_model, num_heads (small demo shapes)

    key = jax.random.PRNGKey(0)
    keys = jax.random.split(key, 9)
    scale = 1.0 / math.sqrt(D)

    # Deterministic synthetic parameters. Weights stored (in, out) so the kernel
    # computes x @ W + b (equivalent to nn.Linear with W.T).
    params = {
        "wq": jax.random.normal(keys[0], (D, D), jnp.float32) * scale,
        "bq": jax.random.normal(keys[1], (1, D), jnp.float32) * 0.01,
        "wk": jax.random.normal(keys[2], (D, D), jnp.float32) * scale,
        "bk": jax.random.normal(keys[3], (1, D), jnp.float32) * 0.01,
        "wv": jax.random.normal(keys[4], (D, D), jnp.float32) * scale,
        "bv": jax.random.normal(keys[5], (1, D), jnp.float32) * 0.01,
        "wo": jax.random.normal(keys[6], (D, D), jnp.float32) * scale,
        "bo": jax.random.normal(keys[7], (1, D), jnp.float32) * 0.01,
    }

    x = jax.random.normal(keys[8], (B, S, D), jnp.float32)

    out = multi_head_attention(x, params, num_heads=H)
    out = jax.block_until_ready(out)

    ref = reference_mha(x, params, num_heads=H)
    assert out.shape == (B, S, D)
    # bf16 MXU inputs + approx-reciprocal softmax -> looser tolerance than pure f32.
    assert jnp.allclose(out, ref, atol=5e-2, rtol=5e-2), "mismatch vs JAX reference"

    print("KERNEL_OK")
</pallas_src>

<mosaic_0001>
module attributes {stable_mosaic.version = 11 : i64} {
  func.func @mha_kernel(%arg0: i32, %arg1: memref<1x8x32xf32, #tpu.memory_space<vmem>>, %arg2: memref<32x32xbf16, #tpu.memory_space<vmem>>, %arg3: memref<1x32xf32, #tpu.memory_space<vmem>>, %arg4: memref<32x32xbf16, #tpu.memory_space<vmem>>, %arg5: memref<1x32xf32, #tpu.memory_space<vmem>>, %arg6: memref<32x32xbf16, #tpu.memory_space<vmem>>, %arg7: memref<1x32xf32, #tpu.memory_space<vmem>>, %arg8: memref<4x8x32xbf16, #tpu.memory_space<vmem>>, %arg9: memref<1x32xf32, #tpu.memory_space<vmem>>, %arg10: memref<1x8x32xf32, #tpu.memory_space<vmem>>, %arg11: memref<4x8x8xbf16, #tpu.memory_space<vmem>>, %arg12: memref<4x8x8xbf16, #tpu.memory_space<vmem>>, %arg13: memref<4x8x8xbf16, #tpu.memory_space<vmem>>, %arg14: memref<8x32xf32, #tpu.memory_space<vmem>>) attributes {dimension_semantics = [#tpu.dimension_semantics<parallel>], iteration_bounds = array<i64: 2>, scalar_prefetch = 0 : i64, scratch_operands = 4 : i64, tpu.core_type = #tpu.core_type<tc>, window_params = [{transform_indices = @transform_0, window_bounds = array<i64: 1, 8, 32>}, {pipeline_mode = #tpu.pipeline_mode<synchronous>, transform_indices = @transform_1, window_bounds = array<i64: 32, 32>}, {pipeline_mode = #tpu.pipeline_mode<synchronous>, transform_indices = @transform_2, window_bounds = array<i64: 1, 32>}, {pipeline_mode = #tpu.pipeline_mode<synchronous>, transform_indices = @transform_3, window_bounds = array<i64: 32, 32>}, {pipeline_mode = #tpu.pipeline_mode<synchronous>, transform_indices = @transform_4, window_bounds = array<i64: 1, 32>}, {pipeline_mode = #tpu.pipeline_mode<synchronous>, transform_indices = @transform_5, window_bounds = array<i64: 32, 32>}, {pipeline_mode = #tpu.pipeline_mode<synchronous>, transform_indices = @transform_6, window_bounds = array<i64: 1, 32>}, {pipeline_mode = #tpu.pipeline_mode<synchronous>, transform_indices = @transform_7, window_bounds = array<i64: 4, 8, 32>}, {pipeline_mode = #tpu.pipeline_mode<synchronous>, transform_indices = @transform_8, window_bounds = array<i64: 1, 32>}, {transform_indices = @transform_9, window_bounds = array<i64: 1, 8, 32>}]} {
    %c0 = arith.constant 0 : index
    %c0_0 = arith.constant 0 : index
    %c0_1 = arith.constant 0 : index
    %0 = vector.load %arg1[%c0, %c0_0, %c0_1] : memref<1x8x32xf32, #tpu.memory_space<vmem>>, vector<1x8x32xf32>
    %1 = vector.shape_cast %0 : vector<1x8x32xf32> to vector<8x32xf32>
    %2 = arith.truncf %1 : vector<8x32xf32> to vector<8x32xbf16>
    %c0_2 = arith.constant 0 : index
    %c0_3 = arith.constant 0 : index
    %3 = vector.load %arg2[%c0_2, %c0_3] : memref<32x32xbf16, #tpu.memory_space<vmem>>, vector<32x32xbf16>
    %cst = arith.constant dense<0.000000e+00> : vector<8x32xf32>
    %4 = tpu.matmul %2, %3, %cst {dimension_numbers = #tpu.dot_dimension_numbers<[1], [0], [0], [1], [0, 0, 1, 1], [], []>} : vector<8x32xbf16>, vector<32x32xbf16>, vector<8x32xf32> -> vector<8x32xf32>
    %c0_4 = arith.constant 0 : index
    %c0_5 = arith.constant 0 : index
    %5 = vector.load %arg3[%c0_4, %c0_5] : memref<1x32xf32, #tpu.memory_space<vmem>>, vector<1x32xf32>
    %6 = vector.broadcast %5 : vector<1x32xf32> to vector<8x32xf32>
    %7 = arith.addf %4, %6 : vector<8x32xf32>
    %cst_6 = arith.constant 0.353553385 : f32
    %8 = vector.broadcast %cst_6 : f32 to vector<8x32xf32>
    %9 = arith.mulf %7, %8 : vector<8x32xf32>
    %c0_7 = arith.constant 0 : index
    %c0_8 = arith.constant 0 : index
    %10 = vector.load %arg4[%c0_7, %c0_8] : memref<32x32xbf16, #tpu.memory_space<vmem>>, vector<32x32xbf16>
    %cst_9 = arith.constant dense<0.000000e+00> : vector<8x32xf32>
    %11 = tpu.matmul %2, %10, %cst_9 {dimension_numbers = #tpu.dot_dimension_numbers<[1], [0], [0], [1], [0, 0, 1, 1], [], []>} : vector<8x32xbf16>, vector<32x32xbf16>, vector<8x32xf32> -> vector<8x32xf32>
    %c0_10 = arith.constant 0 : index
    %c0_11 = arith.constant 0 : index
    %12 = vector.load %arg5[%c0_10, %c0_11] : memref<1x32xf32, #tpu.memory_space<vmem>>, vector<1x32xf32>
    %13 = vector.broadcast %12 : vector<1x32xf32> to vector<8x32xf32>
    %14 = arith.addf %11, %13 : vector<8x32xf32>
    %c0_12 = arith.constant 0 : index
    %c0_13 = arith.constant 0 : index
    %15 = vector.load %arg6[%c0_12, %c0_13] : memref<32x32xbf16, #tpu.memory_space<vmem>>, vector<32x32xbf16>
    %cst_14 = arith.constant dense<0.000000e+00> : vector<8x32xf32>
    %16 = tpu.matmul %2, %15, %cst_14 {dimension_numbers = #tpu.dot_dimension_numbers<[1], [0], [0], [1], [0, 0, 1, 1], [], []>} : vector<8x32xbf16>, vector<32x32xbf16>, vector<8x32xf32> -> vector<8x32xf32>
    %c0_15 = arith.constant 0 : index
    %c0_16 = arith.constant 0 : index
    %17 = vector.load %arg7[%c0_15, %c0_16] : memref<1x32xf32, #tpu.memory_space<vmem>>, vector<1x32xf32>
    %18 = vector.broadcast %17 : vector<1x32xf32> to vector<8x32xf32>
    %19 = arith.addf %16, %18 : vector<8x32xf32>
    %20 = vector.extract_strided_slice %9 {offsets = [0, 0], sizes = [8, 8], strides = [1, 1]} : vector<8x32xf32> to vector<8x8xf32>
    %21 = arith.truncf %20 : vector<8x8xf32> to vector<8x8xbf16>
    %c0_17 = arith.constant 0 : index
    %c0_18 = arith.constant 0 : index
    %c0_19 = arith.constant 0 : index
    %22 = vector.load %arg11[%c0_17, %c0_18, %c0_19] : memref<4x8x8xbf16, #tpu.memory_space<vmem>>, vector<1x8x8xbf16>
    %23 = vector.shape_cast %22 : vector<1x8x8xbf16> to vector<8x8xbf16>
    %24 = vector.shape_cast %21 : vector<8x8xbf16> to vector<1x8x8xbf16>
    tpu.vector_store %arg11[%c0_17, %c0_18, %c0_19], %24 {strides = array<i32>} : memref<4x8x8xbf16, #tpu.memory_space<vmem>>, vector<1x8x8xbf16>,
    %25 = vector.extract_strided_slice %14 {offsets = [0, 0], sizes = [8, 8], strides = [1, 1]} : vector<8x32xf32> to vector<8x8xf32>
    %26 = arith.truncf %25 : vector<8x8xf32> to vector<8x8xbf16>
    %c0_20 = arith.constant 0 : index
    %c0_21 = arith.constant 0 : index
    %c0_22 = arith.constant 0 : index
    %27 = vector.load %arg12[%c0_20, %c0_21, %c0_22] : memref<4x8x8xbf16, #tpu.memory_space<vmem>>, vector<1x8x8xbf16>
    %28 = vector.shape_cast %27 : vector<1x8x8xbf16> to vector<8x8xbf16>
    %29 = vector.shape_cast %26 : vector<8x8xbf16> to vector<1x8x8xbf16>
    tpu.vector_store %arg12[%c0_20, %c0_21, %c0_22], %29 {strides = array<i32>} : memref<4x8x8xbf16, #tpu.memory_space<vmem>>, vector<1x8x8xbf16>,
    %30 = vector.extract_strided_slice %19 {offsets = [0, 0], sizes = [8, 8], strides = [1, 1]} : vector<8x32xf32> to vector<8x8xf32>
    %31 = arith.truncf %30 : vector<8x8xf32> to vector<8x8xbf16>
    %c0_23 = arith.constant 0 : index
    %c0_24 = arith.constant 0 : index
    %c0_25 = arith.constant 0 : index
    %32 = vector.load %arg13[%c0_23, %c0_24, %c0_25] : memref<4x8x8xbf16, #tpu.memory_space<vmem>>, vector<1x8x8xbf16>
    %33 = vector.shape_cast %32 : vector<1x8x8xbf16> to vector<8x8xbf16>
    %34 = vector.shape_cast %31 : vector<8x8xbf16> to vector<1x8x8xbf16>
    tpu.vector_store %arg13[%c0_23, %c0_24, %c0_25], %34 {strides = array<i32>} : memref<4x8x8xbf16, #tpu.memory_space<vmem>>, vector<1x8x8xbf16>,
    %35 = vector.extract_strided_slice %9 {offsets = [0, 8], sizes = [8, 8], strides = [1, 1]} : vector<8x32xf32> to vector<8x8xf32>
    %36 = arith.truncf %35 : vector<8x8xf32> to vector<8x8xbf16>
    %c1 = arith.constant 1 : index
    %c0_26 = arith.constant 0 : index
    %c0_27 = arith.constant 0 : index
    %37 = vector.load %arg11[%c1, %c0_26, %c0_27] : memref<4x8x8xbf16, #tpu.memory_space<vmem>>, vector<1x8x8xbf16>
    %38 = vector.shape_cast %37 : vector<1x8x8xbf16> to vector<8x8xbf16>
    %39 = vector.shape_cast %36 : vector<8x8xbf16> to vector<1x8x8xbf16>
    tpu.vector_store %arg11[%c1, %c0_26, %c0_27], %39 {strides = array<i32>} : memref<4x8x8xbf16, #tpu.memory_space<vmem>>, vector<1x8x8xbf16>,
    %40 = vector.extract_strided_slice %14 {offsets = [0, 8], sizes = [8, 8], strides = [1, 1]} : vector<8x32xf32> to vector<8x8xf32>
    %41 = arith.truncf %40 : vector<8x8xf32> to vector<8x8xbf16>
    %c1_28 = arith.constant 1 : index
    %c0_29 = arith.constant 0 : index
    %c0_30 = arith.constant 0 : index
    %42 = vector.load %arg12[%c1_28, %c0_29, %c0_30] : memref<4x8x8xbf16, #tpu.memory_space<vmem>>, vector<1x8x8xbf16>
    %43 = vector.shape_cast %42 : vector<1x8x8xbf16> to vector<8x8xbf16>
    %44 = vector.shape_cast %41 : vector<8x8xbf16> to vector<1x8x8xbf16>
    tpu.vector_store %arg12[%c1_28, %c0_29, %c0_30], %44 {strides = array<i32>} : memref<4x8x8xbf16, #tpu.memory_space<vmem>>, vector<1x8x8xbf16>,
    %45 = vector.extract_strided_slice %19 {offsets = [0, 8], sizes = [8, 8], strides = [1, 1]} : vector<8x32xf32> to vector<8x8xf32>
    %46 = arith.truncf %45 : vector<8x8xf32> to vector<8x8xbf16>
    %c1_31 = arith.constant 1 : index
    %c0_32 = arith.constant 0 : index
    %c0_33 = arith.constant 0 : index
    %47 = vector.load %arg13[%c1_31, %c0_32, %c0_33] : memref<4x8x8xbf16, #tpu.memory_space<vmem>>, vector<1x8x8xbf16>
    %48 = vector.shape_cast %47 : vector<1x8x8xbf16> to vector<8x8xbf16>
    %49 = vector.shape_cast %46 : vector<8x8xbf16> to vector<1x8x8xbf16>
    tpu.vector_store %arg13[%c1_31, %c0_32, %c0_33], %49 {strides = array<i32>} : memref<4x8x8xbf16, #tpu.memory_space<vmem>>, vector<1x8x8xbf16>,
    %50 = vector.extract_strided_slice %9 {offsets = [0, 16], sizes = [8, 8], strides = [1, 1]} : vector<8x32xf32> to vector<8x8xf32>
    %51 = arith.truncf %50 : vector<8x8xf32> to vector<8x8xbf16>
    %c2 = arith.constant 2 : index
    %c0_34 = arith.constant 0 : index
    %c0_35 = arith.constant 0 : index
    %52 = vector.load %arg11[%c2, %c0_34, %c0_35] : memref<4x8x8xbf16, #tpu.memory_space<vmem>>, vector<1x8x8xbf16>
    %53 = vector.shape_cast %52 : vector<1x8x8xbf16> to vector<8x8xbf16>
    %54 = vector.shape_cast %51 : vector<8x8xbf16> to vector<1x8x8xbf16>
    tpu.vector_store %arg11[%c2, %c0_34, %c0_35], %54 {strides = array<i32>} : memref<4x8x8xbf16, #tpu.memory_space<vmem>>, vector<1x8x8xbf16>,
    %55 = vector.extract_strided_slice %14 {offsets = [0, 16], sizes = [8, 8], strides = [1, 1]} : vector<8x32xf32> to vector<8x8xf32>
    %56 = arith.truncf %55 : vector<8x8xf32> to vector<8x8xbf16>
    %c2_36 = arith.constant 2 : index
    %c0_37 = arith.constant 0 : index
    %c0_38 = arith.constant 0 : index
    %57 = vector.load %arg12[%c2_36, %c0_37, %c0_38] : memref<4x8x8xbf16, #tpu.memory_space<vmem>>, vector<1x8x8xbf16>
    %58 = vector.shape_cast %57 : vector<1x8x8xbf16> to vector<8x8xbf16>
    %59 = vector.shape_cast %56 : vector<8x8xbf16> to vector<1x8x8xbf16>
    tpu.vector_store %arg12[%c2_36, %c0_37, %c0_38], %59 {strides = array<i32>} : memref<4x8x8xbf16, #tpu.memory_space<vmem>>, vector<1x8x8xbf16>,
    %60 = vector.extract_strided_slice %19 {offsets = [0, 16], sizes = [8, 8], strides = [1, 1]} : vector<8x32xf32> to vector<8x8xf32>
    %61 = arith.truncf %60 : vector<8x8xf32> to vector<8x8xbf16>
    %c2_39 = arith.constant 2 : index
    %c0_40 = arith.constant 0 : index
    %c0_41 = arith.constant 0 : index
    %62 = vector.load %arg13[%c2_39, %c0_40, %c0_41] : memref<4x8x8xbf16, #tpu.memory_space<vmem>>, vector<1x8x8xbf16>
    %63 = vector.shape_cast %62 : vector<1x8x8xbf16> to vector<8x8xbf16>
    %64 = vector.shape_cast %61 : vector<8x8xbf16> to vector<1x8x8xbf16>
    tpu.vector_store %arg13[%c2_39, %c0_40, %c0_41], %64 {strides = array<i32>} : memref<4x8x8xbf16, #tpu.memory_space<vmem>>, vector<1x8x8xbf16>,
    %65 = vector.extract_strided_slice %9 {offsets = [0, 24], sizes = [8, 8], strides = [1, 1]} : vector<8x32xf32> to vector<8x8xf32>
    %66 = arith.truncf %65 : vector<8x8xf32> to vector<8x8xbf16>
    %c3 = arith.constant 3 : index
    %c0_42 = arith.constant 0 : index
    %c0_43 = arith.constant 0 : index
    %67 = vector.load %arg11[%c3, %c0_42, %c0_43] : memref<4x8x8xbf16, #tpu.memory_space<vmem>>, vector<1x8x8xbf16>
    %68 = vector.shape_cast %67 : vector<1x8x8xbf16> to vector<8x8xbf16>
    %69 = vector.shape_cast %66 : vector<8x8xbf16> to vector<1x8x8xbf16>
    tpu.vector_store %arg11[%c3, %c0_42, %c0_43], %69 {strides = array<i32>} : memref<4x8x8xbf16, #tpu.memory_space<vmem>>, vector<1x8x8xbf16>,
    %70 = vector.extract_strided_slice %14 {offsets = [0, 24], sizes = [8, 8], strides = [1, 1]} : vector<8x32xf32> to vector<8x8xf32>
    %71 = arith.truncf %70 : vector<8x8xf32> to vector<8x8xbf16>
    %c3_44 = arith.constant 3 : index
    %c0_45 = arith.constant 0 : index
    %c0_46 = arith.constant 0 : index
    %72 = vector.load %arg12[%c3_44, %c0_45, %c0_46] : memref<4x8x8xbf16, #tpu.memory_space<vmem>>, vector<1x8x8xbf16>
    %73 = vector.shape_cast %72 : vector<1x8x8xbf16> to vector<8x8xbf16>
    %74 = vector.shape_cast %71 : vector<8x8xbf16> to vector<1x8x8xbf16>
    tpu.vector_store %arg12[%c3_44, %c0_45, %c0_46], %74 {strides = array<i32>} : memref<4x8x8xbf16, #tpu.memory_space<vmem>>, vector<1x8x8xbf16>,
    %75 = vector.extract_strided_slice %19 {offsets = [0, 24], sizes = [8, 8], strides = [1, 1]} : vector<8x32xf32> to vector<8x8xf32>
    %76 = arith.truncf %75 : vector<8x8xf32> to vector<8x8xbf16>
    %c3_47 = arith.constant 3 : index
    %c0_48 = arith.constant 0 : index
    %c0_49 = arith.constant 0 : index
    %77 = vector.load %arg13[%c3_47, %c0_48, %c0_49] : memref<4x8x8xbf16, #tpu.memory_space<vmem>>, vector<1x8x8xbf16>
    %78 = vector.shape_cast %77 : vector<1x8x8xbf16> to vector<8x8xbf16>
    %79 = vector.shape_cast %76 : vector<8x8xbf16> to vector<1x8x8xbf16>
    tpu.vector_store %arg13[%c3_47, %c0_48, %c0_49], %79 {strides = array<i32>} : memref<4x8x8xbf16, #tpu.memory_space<vmem>>, vector<1x8x8xbf16>,
    %cst_50 = arith.constant 0.000000e+00 : f32
    %80 = vector.broadcast %cst_50 : f32 to vector<8x32xf32>
    %c0_51 = arith.constant 0 : index
    %c0_52 = arith.constant 0 : index
    %81 = vector.load %arg14[%c0_51, %c0_52] : memref<8x32xf32, #tpu.memory_space<vmem>>, vector<8x32xf32>
    tpu.vector_store %arg14[%c0_51, %c0_52], %80 {strides = array<i32>} : memref<8x32xf32, #tpu.memory_space<vmem>>, vector<8x32xf32>,
    %c0_i32 = arith.constant 0 : i32
    %c4_i32 = arith.constant 4 : i32
    %82 = arith.addi %c0_i32, %c4_i32 : i32
    %c1_i32 = arith.constant 1 : i32
    scf.for %arg15 = %c0_i32 to %82 step %c1_i32  : i32 {
      %90 = arith.index_cast %arg15 : i32 to index
      %c0_61 = arith.constant 0 : index
      %c0_62 = arith.constant 0 : index
      %91 = vector.load %arg11[%90, %c0_61, %c0_62] : memref<4x8x8xbf16, #tpu.memory_space<vmem>>, vector<1x8x8xbf16>
      %92 = vector.shape_cast %91 : vector<1x8x8xbf16> to vector<8x8xbf16>
      %93 = arith.index_cast %arg15 : i32 to index
      %c0_63 = arith.constant 0 : index
      %c0_64 = arith.constant 0 : index
      %94 = vector.load %arg12[%93, %c0_63, %c0_64] : memref<4x8x8xbf16, #tpu.memory_space<vmem>>, vector<1x8x8xbf16>
      %95 = vector.shape_cast %94 : vector<1x8x8xbf16> to vector<8x8xbf16>
      %96 = arith.index_cast %arg15 : i32 to index
      %c0_65 = arith.constant 0 : index
      %c0_66 = arith.constant 0 : index
      %97 = vector.load %arg13[%96, %c0_65, %c0_66] : memref<4x8x8xbf16, #tpu.memory_space<vmem>>, vector<1x8x8xbf16>
      %98 = vector.shape_cast %97 : vector<1x8x8xbf16> to vector<8x8xbf16>
      %cst_67 = arith.constant dense<0.000000e+00> : vector<8x8xf32>
      %99 = tpu.matmul %92, %95, %cst_67 {dimension_numbers = #tpu.dot_dimension_numbers<[1], [1], [0], [0], [0, 0, 1, 0], [], []>} : vector<8x8xbf16>, vector<8x8xbf16>, vector<8x8xf32> -> vector<8x8xf32>
      %cst_68 = arith.constant dense<0xFF800000> : vector<8xf32>
      %100 = vector.multi_reduction <maximumf>, %99, %cst_68 [1] : vector<8x8xf32> to vector<8xf32>
      %101 = vector.shape_cast %100 : vector<8xf32> to vector<8x1xf32>
      %102 = vector.broadcast %101 : vector<8x1xf32> to vector<8x8xf32>
      %103 = arith.subf %99, %102 : vector<8x8xf32>
      %104 = math.exp %103 : vector<8x8xf32>
      %cst_69 = arith.constant dense<0.000000e+00> : vector<8xf32>
      %105 = vector.multi_reduction <add>, %104, %cst_69 [1] : vector<8x8xf32> to vector<8xf32>
      %106 = vector.shape_cast %105 : vector<8xf32> to vector<8x1xf32>
      %107 = arith.truncf %104 : vector<8x8xf32> to vector<8x8xbf16>
      %cst_70 = arith.constant dense<0.000000e+00> : vector<8x8xf32>
      %108 = tpu.matmul %107, %98, %cst_70 {dimension_numbers = #tpu.dot_dimension_numbers<[1], [0], [0], [1], [0, 0, 1, 1], [], []>} : vector<8x8xbf16>, vector<8x8xbf16>, vector<8x8xf32> -> vector<8x8xf32>
      %109 = tpu.reciprocal %106 {approx = true} : vector<8x1xf32> -> vector<8x1xf32>
      %110 = vector.broadcast %109 : vector<8x1xf32> to vector<8x8xf32>
      %111 = arith.mulf %108, %110 : vector<8x8xf32>
      %c0_71 = arith.constant 0 : index
      %c0_72 = arith.constant 0 : index
      %112 = vector.load %arg14[%c0_71, %c0_72] : memref<8x32xf32, #tpu.memory_space<vmem>>, vector<8x32xf32>
      %113 = arith.truncf %111 : vector<8x8xf32> to vector<8x8xbf16>
      %114 = arith.index_cast %arg15 : i32 to index
      %c0_73 = arith.constant 0 : index
      %c0_74 = arith.constant 0 : index
      %115 = vector.load %arg8[%114, %c0_73, %c0_74] : memref<4x8x32xbf16, #tpu.memory_space<vmem>>, vector<1x8x32xbf16>
      %116 = vector.shape_cast %115 : vector<1x8x32xbf16> to vector<8x32xbf16>
      %cst_75 = arith.constant dense<0.000000e+00> : vector<8x32xf32>
      %117 = tpu.matmul %113, %116, %cst_75 {dimension_numbers = #tpu.dot_dimension_numbers<[1], [0], [0], [1], [0, 0, 1, 1], [], []>} : vector<8x8xbf16>, vector<8x32xbf16>, vector<8x32xf32> -> vector<8x32xf32>
      %118 = arith.addf %112, %117 : vector<8x32xf32>
      %c0_76 = arith.constant 0 : index
      %c0_77 = arith.constant 0 : index
      %119 = vector.load %arg14[%c0_76, %c0_77] : memref<8x32xf32, #tpu.memory_space<vmem>>, vector<8x32xf32>
      tpu.vector_store %arg14[%c0_76, %c0_77], %118 {strides = array<i32>} : memref<8x32xf32, #tpu.memory_space<vmem>>, vector<8x32xf32>,
    }
    %c4_i32_53 = arith.constant 4 : i32
    %c0_54 = arith.constant 0 : index
    %c0_55 = arith.constant 0 : index
    %83 = vector.load %arg14[%c0_54, %c0_55] : memref<8x32xf32, #tpu.memory_space<vmem>>, vector<8x32xf32>
    %c0_56 = arith.constant 0 : index
    %c0_57 = arith.constant 0 : index
    %84 = vector.load %arg9[%c0_56, %c0_57] : memref<1x32xf32, #tpu.memory_space<vmem>>, vector<1x32xf32>
    %85 = vector.broadcast %84 : vector<1x32xf32> to vector<8x32xf32>
    %86 = arith.addf %83, %85 : vector<8x32xf32>
    %c0_58 = arith.constant 0 : index
    %c0_59 = arith.constant 0 : index
    %c0_60 = arith.constant 0 : index
    %87 = vector.load %arg10[%c0_58, %c0_59, %c0_60] : memref<1x8x32xf32, #tpu.memory_space<vmem>>, vector<1x8x32xf32>
    %88 = vector.shape_cast %87 : vector<1x8x32xf32> to vector<8x32xf32>
    %89 = vector.shape_cast %86 : vector<8x32xf32> to vector<1x8x32xf32>
    tpu.vector_store %arg10[%c0_58, %c0_59, %c0_60], %89 {strides = array<i32>} : memref<1x8x32xf32, #tpu.memory_space<vmem>>, vector<1x8x32xf32>,
    return
  }
  func.func @transform_0(%arg0: i32) -> (i32, i32, i32) {
    %c0_i32 = arith.constant 0 : i32
    %c0_i32_0 = arith.constant 0 : i32
    %c0_i32_1 = arith.constant 0 : i32
    return %arg0, %c0_i32, %c0_i32_0 : i32, i32, i32
  }
  func.func @transform_1(%arg0: i32) -> (i32, i32) {
    %c0_i32 = arith.constant 0 : i32
    %c0_i32_0 = arith.constant 0 : i32
    %c0_i32_1 = arith.constant 0 : i32
    return %c0_i32, %c0_i32_0 : i32, i32
  }
  func.func @transform_2(%arg0: i32) -> (i32, i32) {
    %c0_i32 = arith.constant 0 : i32
    %c0_i32_0 = arith.constant 0 : i32
    %c0_i32_1 = arith.constant 0 : i32
    return %c0_i32, %c0_i32_0 : i32, i32
  }
  func.func @transform_3(%arg0: i32) -> (i32, i32) {
    %c0_i32 = arith.constant 0 : i32
    %c0_i32_0 = arith.constant 0 : i32
    %c0_i32_1 = arith.constant 0 : i32
    return %c0_i32, %c0_i32_0 : i32, i32
  }
  func.func @transform_4(%arg0: i32) -> (i32, i32) {
    %c0_i32 = arith.constant 0 : i32
    %c0_i32_0 = arith.constant 0 : i32
    %c0_i32_1 = arith.constant 0 : i32
    return %c0_i32, %c0_i32_0 : i32, i32
  }
  func.func @transform_5(%arg0: i32) -> (i32, i32) {
    %c0_i32 = arith.constant 0 : i32
    %c0_i32_0 = arith.constant 0 : i32
    %c0_i32_1 = arith.constant 0 : i32
    return %c0_i32, %c0_i32_0 : i32, i32
  }
  func.func @transform_6(%arg0: i32) -> (i32, i32) {
    %c0_i32 = arith.constant 0 : i32
    %c0_i32_0 = arith.constant 0 : i32
    %c0_i32_1 = arith.constant 0 : i32
    return %c0_i32, %c0_i32_0 : i32, i32
  }
  func.func @transform_7(%arg0: i32) -> (i32, i32, i32) {
    %c0_i32 = arith.constant 0 : i32
    %c0_i32_0 = arith.constant 0 : i32
    %c0_i32_1 = arith.constant 0 : i32
    %c0_i32_2 = arith.constant 0 : i32
    return %c0_i32, %c0_i32_0, %c0_i32_1 : i32, i32, i32
  }
  func.func @transform_8(%arg0: i32) -> (i32, i32) {
    %c0_i32 = arith.constant 0 : i32
    %c0_i32_0 = arith.constant 0 : i32
    %c0_i32_1 = arith.constant 0 : i32
    return %c0_i32, %c0_i32_0 : i32, i32
  }
  func.func @transform_9(%arg0: i32) -> (i32, i32, i32) {
    %c0_i32 = arith.constant 0 : i32
    %c0_i32_0 = arith.constant 0 : i32
    %c0_i32_1 = arith.constant 0 : i32
    return %arg0, %c0_i32, %c0_i32_0 : i32, i32, i32
  }
}

module attributes {stable_mosaic.version = 11 : i64} {
  func.func @mha_kernel(%arg0: i32, %arg1: memref<1x8x32xf32, #tpu.memory_space<vmem>>, %arg2: memref<32x32xbf16, #tpu.memory_space<vmem>>, %arg3: memref<1x32xf32, #tpu.memory_space<vmem>>, %arg4: memref<32x32xbf16, #tpu.memory_space<vmem>>, %arg5: memref<1x32xf32, #tpu.memory_space<vmem>>, %arg6: memref<32x32xbf16, #tpu.memory_space<vmem>>, %arg7: memref<1x32xf32, #tpu.memory_space<vmem>>, %arg8: memref<4x8x32xbf16, #tpu.memory_space<vmem>>, %arg9: memref<1x32xf32, #tpu.memory_space<vmem>>, %arg10: memref<1x8x32xf32, #tpu.memory_space<vmem>>, %arg11: memref<4x8x8xbf16, #tpu.memory_space<vmem>>, %arg12: memref<4x8x8xbf16, #tpu.memory_space<vmem>>, %arg13: memref<4x8x8xbf16, #tpu.memory_space<vmem>>, %arg14: memref<8x32xf32, #tpu.memory_space<vmem>>) attributes {dimension_semantics = [#tpu.dimension_semantics<parallel>], iteration_bounds = array<i64: 2>, scalar_prefetch = 0 : i64, scratch_operands = 4 : i64, tpu.core_type = #tpu.core_type<tc>, window_params = [{transform_indices = @transform_0, window_bounds = array<i64: 1, 8, 32>}, {pipeline_mode = #tpu.pipeline_mode<synchronous>, transform_indices = @transform_1, window_bounds = array<i64: 32, 32>}, {pipeline_mode = #tpu.pipeline_mode<synchronous>, transform_indices = @transform_2, window_bounds = array<i64: 1, 32>}, {pipeline_mode = #tpu.pipeline_mode<synchronous>, transform_indices = @transform_3, window_bounds = array<i64: 32, 32>}, {pipeline_mode = #tpu.pipeline_mode<synchronous>, transform_indices = @transform_4, window_bounds = array<i64: 1, 32>}, {pipeline_mode = #tpu.pipeline_mode<synchronous>, transform_indices = @transform_5, window_bounds = array<i64: 32, 32>}, {pipeline_mode = #tpu.pipeline_mode<synchronous>, transform_indices = @transform_6, window_bounds = array<i64: 1, 32>}, {pipeline_mode = #tpu.pipeline_mode<synchronous>, transform_indices = @transform_7, window_bounds = array<i64: 4, 8, 32>}, {pipeline_mode = #tpu.pipeline_mode<synchronous>, transform_indices = @transform_8, window_bounds = array<i64: 1, 32>}, {transform_indices = @transform_9, window_bounds = array<i64: 1, 8, 32>}]} {
    %c0 = arith.constant 0 : index
    %c0_0 = arith.constant 0 : index
    %c0_1 = arith.constant 0 : index
    %0 = vector.load %arg1[%c0, %c0_0, %c0_1] : memref<1x8x32xf32, #tpu.memory_space<vmem>>, vector<1x8x32xf32>
    %1 = vector.shape_cast %0 : vector<1x8x32xf32> to vector<8x32xf32>
    %2 = arith.truncf %1 : vector<8x32xf32> to vector<8x32xbf16>
    %c0_2 = arith.constant 0 : index
    %c0_3 = arith.constant 0 : index
    %3 = vector.load %arg2[%c0_2, %c0_3] : memref<32x32xbf16, #tpu.memory_space<vmem>>, vector<32x32xbf16>
    %cst = arith.constant dense<0.000000e+00> : vector<8x32xf32>
    %4 = tpu.matmul %2, %3, %cst {dimension_numbers = #tpu.dot_dimension_numbers<[1], [0], [0], [1], [0, 0, 1, 1], [], []>} : vector<8x32xbf16>, vector<32x32xbf16>, vector<8x32xf32> -> vector<8x32xf32>
    %c0_4 = arith.constant 0 : index
    %c0_5 = arith.constant 0 : index
    %5 = vector.load %arg3[%c0_4, %c0_5] : memref<1x32xf32, #tpu.memory_space<vmem>>, vector<1x32xf32>
    %6 = vector.broadcast %5 : vector<1x32xf32> to vector<8x32xf32>
    %7 = arith.addf %4, %6 : vector<8x32xf32>
    %cst_6 = arith.constant 0.353553385 : f32
    %8 = vector.broadcast %cst_6 : f32 to vector<8x32xf32>
    %9 = arith.mulf %7, %8 : vector<8x32xf32>
    %c0_7 = arith.constant 0 : index
    %c0_8 = arith.constant 0 : index
    %10 = vector.load %arg4[%c0_7, %c0_8] : memref<32x32xbf16, #tpu.memory_space<vmem>>, vector<32x32xbf16>
    %cst_9 = arith.constant dense<0.000000e+00> : vector<8x32xf32>
    %11 = tpu.matmul %2, %10, %cst_9 {dimension_numbers = #tpu.dot_dimension_numbers<[1], [0], [0], [1], [0, 0, 1, 1], [], []>} : vector<8x32xbf16>, vector<32x32xbf16>, vector<8x32xf32> -> vector<8x32xf32>
    %c0_10 = arith.constant 0 : index
    %c0_11 = arith.constant 0 : index
    %12 = vector.load %arg5[%c0_10, %c0_11] : memref<1x32xf32, #tpu.memory_space<vmem>>, vector<1x32xf32>
    %13 = vector.broadcast %12 : vector<1x32xf32> to vector<8x32xf32>
    %14 = arith.addf %11, %13 : vector<8x32xf32>
    %c0_12 = arith.constant 0 : index
    %c0_13 = arith.constant 0 : index
    %15 = vector.load %arg6[%c0_12, %c0_13] : memref<32x32xbf16, #tpu.memory_space<vmem>>, vector<32x32xbf16>
    %cst_14 = arith.constant dense<0.000000e+00> : vector<8x32xf32>
    %16 = tpu.matmul %2, %15, %cst_14 {dimension_numbers = #tpu.dot_dimension_numbers<[1], [0], [0], [1], [0, 0, 1, 1], [], []>} : vector<8x32xbf16>, vector<32x32xbf16>, vector<8x32xf32> -> vector<8x32xf32>
    %c0_15 = arith.constant 0 : index
    %c0_16 = arith.constant 0 : index
    %17 = vector.load %arg7[%c0_15, %c0_16] : memref<1x32xf32, #tpu.memory_space<vmem>>, vector<1x32xf32>
    %18 = vector.broadcast %17 : vector<1x32xf32> to vector<8x32xf32>
    %19 = arith.addf %16, %18 : vector<8x32xf32>
    %20 = vector.extract_strided_slice %9 {offsets = [0, 0], sizes = [8, 8], strides = [1, 1]} : vector<8x32xf32> to vector<8x8xf32>
    %21 = arith.truncf %20 : vector<8x8xf32> to vector<8x8xbf16>
    %c0_17 = arith.constant 0 : index
    %c0_18 = arith.constant 0 : index
    %c0_19 = arith.constant 0 : index
    %22 = vector.load %arg11[%c0_17, %c0_18, %c0_19] : memref<4x8x8xbf16, #tpu.memory_space<vmem>>, vector<1x8x8xbf16>
    %23 = vector.shape_cast %22 : vector<1x8x8xbf16> to vector<8x8xbf16>
    %24 = vector.shape_cast %21 : vector<8x8xbf16> to vector<1x8x8xbf16>
    tpu.vector_store %arg11[%c0_17, %c0_18, %c0_19], %24 {strides = array<i32>} : memref<4x8x8xbf16, #tpu.memory_space<vmem>>, vector<1x8x8xbf16>,
    %25 = vector.extract_strided_slice %14 {offsets = [0, 0], sizes = [8, 8], strides = [1, 1]} : vector<8x32xf32> to vector<8x8xf32>
    %26 = arith.truncf %25 : vector<8x8xf32> to vector<8x8xbf16>
    %c0_20 = arith.constant 0 : index
    %c0_21 = arith.constant 0 : index
    %c0_22 = arith.constant 0 : index
    %27 = vector.load %arg12[%c0_20, %c0_21, %c0_22] : memref<4x8x8xbf16, #tpu.memory_space<vmem>>, vector<1x8x8xbf16>
    %28 = vector.shape_cast %27 : vector<1x8x8xbf16> to vector<8x8xbf16>
    %29 = vector.shape_cast %26 : vector<8x8xbf16> to vector<1x8x8xbf16>
    tpu.vector_store %arg12[%c0_20, %c0_21, %c0_22], %29 {strides = array<i32>} : memref<4x8x8xbf16, #tpu.memory_space<vmem>>, vector<1x8x8xbf16>,
    %30 = vector.extract_strided_slice %19 {offsets = [0, 0], sizes = [8, 8], strides = [1, 1]} : vector<8x32xf32> to vector<8x8xf32>
    %31 = arith.truncf %30 : vector<8x8xf32> to vector<8x8xbf16>
    %c0_23 = arith.constant 0 : index
    %c0_24 = arith.constant 0 : index
    %c0_25 = arith.constant 0 : index
    %32 = vector.load %arg13[%c0_23, %c0_24, %c0_25] : memref<4x8x8xbf16, #tpu.memory_space<vmem>>, vector<1x8x8xbf16>
    %33 = vector.shape_cast %32 : vector<1x8x8xbf16> to vector<8x8xbf16>
    %34 = vector.shape_cast %31 : vector<8x8xbf16> to vector<1x8x8xbf16>
    tpu.vector_store %arg13[%c0_23, %c0_24, %c0_25], %34 {strides = array<i32>} : memref<4x8x8xbf16, #tpu.memory_space<vmem>>, vector<1x8x8xbf16>,
    %35 = vector.extract_strided_slice %9 {offsets = [0, 8], sizes = [8, 8], strides = [1, 1]} : vector<8x32xf32> to vector<8x8xf32>
    %36 = arith.truncf %35 : vector<8x8xf32> to vector<8x8xbf16>
    %c1 = arith.constant 1 : index
    %c0_26 = arith.constant 0 : index
    %c0_27 = arith.constant 0 : index
    %37 = vector.load %arg11[%c1, %c0_26, %c0_27] : memref<4x8x8xbf16, #tpu.memory_space<vmem>>, vector<1x8x8xbf16>
    %38 = vector.shape_cast %37 : vector<1x8x8xbf16> to vector<8x8xbf16>
    %39 = vector.shape_cast %36 : vector<8x8xbf16> to vector<1x8x8xbf16>
    tpu.vector_store %arg11[%c1, %c0_26, %c0_27], %39 {strides = array<i32>} : memref<4x8x8xbf16, #tpu.memory_space<vmem>>, vector<1x8x8xbf16>,
    %40 = vector.extract_strided_slice %14 {offsets = [0, 8], sizes = [8, 8], strides = [1, 1]} : vector<8x32xf32> to vector<8x8xf32>
    %41 = arith.truncf %40 : vector<8x8xf32> to vector<8x8xbf16>
    %c1_28 = arith.constant 1 : index
    %c0_29 = arith.constant 0 : index
    %c0_30 = arith.constant 0 : index
    %42 = vector.load %arg12[%c1_28, %c0_29, %c0_30] : memref<4x8x8xbf16, #tpu.memory_space<vmem>>, vector<1x8x8xbf16>
    %43 = vector.shape_cast %42 : vector<1x8x8xbf16> to vector<8x8xbf16>
    %44 = vector.shape_cast %41 : vector<8x8xbf16> to vector<1x8x8xbf16>
    tpu.vector_store %arg12[%c1_28, %c0_29, %c0_30], %44 {strides = array<i32>} : memref<4x8x8xbf16, #tpu.memory_space<vmem>>, vector<1x8x8xbf16>,
    %45 = vector.extract_strided_slice %19 {offsets = [0, 8], sizes = [8, 8], strides = [1, 1]} : vector<8x32xf32> to vector<8x8xf32>
    %46 = arith.truncf %45 : vector<8x8xf32> to vector<8x8xbf16>
    %c1_31 = arith.constant 1 : index
    %c0_32 = arith.constant 0 : index
    %c0_33 = arith.constant 0 : index
    %47 = vector.load %arg13[%c1_31, %c0_32, %c0_33] : memref<4x8x8xbf16, #tpu.memory_space<vmem>>, vector<1x8x8xbf16>
    %48 = vector.shape_cast %47 : vector<1x8x8xbf16> to vector<8x8xbf16>
    %49 = vector.shape_cast %46 : vector<8x8xbf16> to vector<1x8x8xbf16>
    tpu.vector_store %arg13[%c1_31, %c0_32, %c0_33], %49 {strides = array<i32>} : memref<4x8x8xbf16, #tpu.memory_space<vmem>>, vector<1x8x8xbf16>,
    %50 = vector.extract_strided_slice %9 {offsets = [0, 16], sizes = [8, 8], strides = [1, 1]} : vector<8x32xf32> to vector<8x8xf32>
    %51 = arith.truncf %50 : vector<8x8xf32> to vector<8x8xbf16>
    %c2 = arith.constant 2 : index
    %c0_34 = arith.constant 0 : index
    %c0_35 = arith.constant 0 : index
    %52 = vector.load %arg11[%c2, %c0_34, %c0_35] : memref<4x8x8xbf16, #tpu.memory_space<vmem>>, vector<1x8x8xbf16>
    %53 = vector.shape_cast %52 : vector<1x8x8xbf16> to vector<8x8xbf16>
    %54 = vector.shape_cast %51 : vector<8x8xbf16> to vector<1x8x8xbf16>
    tpu.vector_store %arg11[%c2, %c0_34, %c0_35], %54 {strides = array<i32>} : memref<4x8x8xbf16, #tpu.memory_space<vmem>>, vector<1x8x8xbf16>,
    %55 = vector.extract_strided_slice %14 {offsets = [0, 16], sizes = [8, 8], strides = [1, 1]} : vector<8x32xf32> to vector<8x8xf32>
    %56 = arith.truncf %55 : vector<8x8xf32> to vector<8x8xbf16>
    %c2_36 = arith.constant 2 : index
    %c0_37 = arith.constant 0 : index
    %c0_38 = arith.constant 0 : index
    %57 = vector.load %arg12[%c2_36, %c0_37, %c0_38] : memref<4x8x8xbf16, #tpu.memory_space<vmem>>, vector<1x8x8xbf16>
    %58 = vector.shape_cast %57 : vector<1x8x8xbf16> to vector<8x8xbf16>
    %59 = vector.shape_cast %56 : vector<8x8xbf16> to vector<1x8x8xbf16>
    tpu.vector_store %arg12[%c2_36, %c0_37, %c0_38], %59 {strides = array<i32>} : memref<4x8x8xbf16, #tpu.memory_space<vmem>>, vector<1x8x8xbf16>,
    %60 = vector.extract_strided_slice %19 {offsets = [0, 16], sizes = [8, 8], strides = [1, 1]} : vector<8x32xf32> to vector<8x8xf32>
    %61 = arith.truncf %60 : vector<8x8xf32> to vector<8x8xbf16>
    %c2_39 = arith.constant 2 : index
    %c0_40 = arith.constant 0 : index
    %c0_41 = arith.constant 0 : index
    %62 = vector.load %arg13[%c2_39, %c0_40, %c0_41] : memref<4x8x8xbf16, #tpu.memory_space<vmem>>, vector<1x8x8xbf16>
    %63 = vector.shape_cast %62 : vector<1x8x8xbf16> to vector<8x8xbf16>
    %64 = vector.shape_cast %61 : vector<8x8xbf16> to vector<1x8x8xbf16>
    tpu.vector_store %arg13[%c2_39, %c0_40, %c0_41], %64 {strides = array<i32>} : memref<4x8x8xbf16, #tpu.memory_space<vmem>>, vector<1x8x8xbf16>,
    %65 = vector.extract_strided_slice %9 {offsets = [0, 24], sizes = [8, 8], strides = [1, 1]} : vector<8x32xf32> to vector<8x8xf32>
    %66 = arith.truncf %65 : vector<8x8xf32> to vector<8x8xbf16>
    %c3 = arith.constant 3 : index
    %c0_42 = arith.constant 0 : index
    %c0_43 = arith.constant 0 : index
    %67 = vector.load %arg11[%c3, %c0_42, %c0_43] : memref<4x8x8xbf16, #tpu.memory_space<vmem>>, vector<1x8x8xbf16>
    %68 = vector.shape_cast %67 : vector<1x8x8xbf16> to vector<8x8xbf16>
    %69 = vector.shape_cast %66 : vector<8x8xbf16> to vector<1x8x8xbf16>
    tpu.vector_store %arg11[%c3, %c0_42, %c0_43], %69 {strides = array<i32>} : memref<4x8x8xbf16, #tpu.memory_space<vmem>>, vector<1x8x8xbf16>,
    %70 = vector.extract_strided_slice %14 {offsets = [0, 24], sizes = [8, 8], strides = [1, 1]} : vector<8x32xf32> to vector<8x8xf32>
    %71 = arith.truncf %70 : vector<8x8xf32> to vector<8x8xbf16>
    %c3_44 = arith.constant 3 : index
    %c0_45 = arith.constant 0 : index
    %c0_46 = arith.constant 0 : index
    %72 = vector.load %arg12[%c3_44, %c0_45, %c0_46] : memref<4x8x8xbf16, #tpu.memory_space<vmem>>, vector<1x8x8xbf16>
    %73 = vector.shape_cast %72 : vector<1x8x8xbf16> to vector<8x8xbf16>
    %74 = vector.shape_cast %71 : vector<8x8xbf16> to vector<1x8x8xbf16>
    tpu.vector_store %arg12[%c3_44, %c0_45, %c0_46], %74 {strides = array<i32>} : memref<4x8x8xbf16, #tpu.memory_space<vmem>>, vector<1x8x8xbf16>,
    %75 = vector.extract_strided_slice %19 {offsets = [0, 24], sizes = [8, 8], strides = [1, 1]} : vector<8x32xf32> to vector<8x8xf32>
    %76 = arith.truncf %75 : vector<8x8xf32> to vector<8x8xbf16>
    %c3_47 = arith.constant 3 : index
    %c0_48 = arith.constant 0 : index
    %c0_49 = arith.constant 0 : index
    %77 = vector.load %arg13[%c3_47, %c0_48, %c0_49] : memref<4x8x8xbf16, #tpu.memory_space<vmem>>, vector<1x8x8xbf16>
    %78 = vector.shape_cast %77 : vector<1x8x8xbf16> to vector<8x8xbf16>
    %79 = vector.shape_cast %76 : vector<8x8xbf16> to vector<1x8x8xbf16>
    tpu.vector_store %arg13[%c3_47, %c0_48, %c0_49], %79 {strides = array<i32>} : memref<4x8x8xbf16, #tpu.memory_space<vmem>>, vector<1x8x8xbf16>,
    %cst_50 = arith.constant 0.000000e+00 : f32
    %80 = vector.broadcast %cst_50 : f32 to vector<8x32xf32>
    %c0_51 = arith.constant 0 : index
    %c0_52 = arith.constant 0 : index
    %81 = vector.load %arg14[%c0_51, %c0_52] : memref<8x32xf32, #tpu.memory_space<vmem>>, vector<8x32xf32>
    tpu.vector_store %arg14[%c0_51, %c0_52], %80 {strides = array<i32>} : memref<8x32xf32, #tpu.memory_space<vmem>>, vector<8x32xf32>,
    %c0_i32 = arith.constant 0 : i32
    %c4_i32 = arith.constant 4 : i32
    %82 = arith.addi %c0_i32, %c4_i32 : i32
    %c1_i32 = arith.constant 1 : i32
    scf.for %arg15 = %c0_i32 to %82 step %c1_i32  : i32 {
      %90 = arith.index_cast %arg15 : i32 to index
      %c0_61 = arith.constant 0 : index
      %c0_62 = arith.constant 0 : index
      %91 = vector.load %arg11[%90, %c0_61, %c0_62] : memref<4x8x8xbf16, #tpu.memory_space<vmem>>, vector<1x8x8xbf16>
      %92 = vector.shape_cast %91 : vector<1x8x8xbf16> to vector<8x8xbf16>
      %93 = arith.index_cast %arg15 : i32 to index
      %c0_63 = arith.constant 0 : index
      %c0_64 = arith.constant 0 : index
      %94 = vector.load %arg12[%93, %c0_63, %c0_64] : memref<4x8x8xbf16, #tpu.memory_space<vmem>>, vector<1x8x8xbf16>
      %95 = vector.shape_cast %94 : vector<1x8x8xbf16> to vector<8x8xbf16>
      %96 = arith.index_cast %arg15 : i32 to index
      %c0_65 = arith.constant 0 : index
      %c0_66 = arith.constant 0 : index
      %97 = vector.load %arg13[%96, %c0_65, %c0_66] : memref<4x8x8xbf16, #tpu.memory_space<vmem>>, vector<1x8x8xbf16>
      %98 = vector.shape_cast %97 : vector<1x8x8xbf16> to vector<8x8xbf16>
      %cst_67 = arith.constant dense<0.000000e+00> : vector<8x8xf32>
      %99 = tpu.matmul %92, %95, %cst_67 {dimension_numbers = #tpu.dot_dimension_numbers<[1], [1], [0], [0], [0, 0, 1, 0], [], []>} : vector<8x8xbf16>, vector<8x8xbf16>, vector<8x8xf32> -> vector<8x8xf32>
      %cst_68 = arith.constant dense<0xFF800000> : vector<8xf32>
      %100 = vector.multi_reduction <maximumf>, %99, %cst_68 [1] : vector<8x8xf32> to vector<8xf32>
      %101 = vector.shape_cast %100 : vector<8xf32> to vector<8x1xf32>
      %102 = vector.broadcast %101 : vector<8x1xf32> to vector<8x8xf32>
      %103 = arith.subf %99, %102 : vector<8x8xf32>
      %104 = math.exp %103 : vector<8x8xf32>
      %cst_69 = arith.constant dense<0.000000e+00> : vector<8xf32>
      %105 = vector.multi_reduction <add>, %104, %cst_69 [1] : vector<8x8xf32> to vector<8xf32>
      %106 = vector.shape_cast %105 : vector<8xf32> to vector<8x1xf32>
      %107 = arith.truncf %104 : vector<8x8xf32> to vector<8x8xbf16>
      %cst_70 = arith.constant dense<0.000000e+00> : vector<8x8xf32>
      %108 = tpu.matmul %107, %98, %cst_70 {dimension_numbers = #tpu.dot_dimension_numbers<[1], [0], [0], [1], [0, 0, 1, 1], [], []>} : vector<8x8xbf16>, vector<8x8xbf16>, vector<8x8xf32> -> vector<8x8xf32>
      %109 = tpu.reciprocal %106 {approx = true} : vector<8x1xf32> -> vector<8x1xf32>
      %110 = vector.broadcast %109 : vector<8x1xf32> to vector<8x8xf32>
      %111 = arith.mulf %108, %110 : vector<8x8xf32>
      %c0_71 = arith.constant 0 : index
      %c0_72 = arith.constant 0 : index
      %112 = vector.load %arg14[%c0_71, %c0_72] : memref<8x32xf32, #tpu.memory_space<vmem>>, vector<8x32xf32>
      %113 = arith.truncf %111 : vector<8x8xf32> to vector<8x8xbf16>
      %114 = arith.index_cast %arg15 : i32 to index
      %c0_73 = arith.constant 0 : index
      %c0_74 = arith.constant 0 : index
      %115 = vector.load %arg8[%114, %c0_73, %c0_74] : memref<4x8x32xbf16, #tpu.memory_space<vmem>>, vector<1x8x32xbf16>
      %116 = vector.shape_cast %115 : vector<1x8x32xbf16> to vector<8x32xbf16>
      %cst_75 = arith.constant dense<0.000000e+00> : vector<8x32xf32>
      %117 = tpu.matmul %113, %116, %cst_75 {dimension_numbers = #tpu.dot_dimension_numbers<[1], [0], [0], [1], [0, 0, 1, 1], [], []>} : vector<8x8xbf16>, vector<8x32xbf16>, vector<8x32xf32> -> vector<8x32xf32>
      %118 = arith.addf %112, %117 : vector<8x32xf32>
      %c0_76 = arith.constant 0 : index
      %c0_77 = arith.constant 0 : index
      %119 = vector.load %arg14[%c0_76, %c0_77] : memref<8x32xf32, #tpu.memory_space<vmem>>, vector<8x32xf32>
      tpu.vector_store %arg14[%c0_76, %c0_77], %118 {strides = array<i32>} : memref<8x32xf32, #tpu.memory_space<vmem>>, vector<8x32xf32>,
    }
    %c4_i32_53 = arith.constant 4 : i32
    %c0_54 = arith.constant 0 : index
    %c0_55 = arith.constant 0 : index
    %83 = vector.load %arg14[%c0_54, %c0_55] : memref<8x32xf32, #tpu.memory_space<vmem>>, vector<8x32xf32>
    %c0_56 = arith.constant 0 : index
    %c0_57 = arith.constant 0 : index
    %84 = vector.load %arg9[%c0_56, %c0_57] : memref<1x32xf32, #tpu.memory_space<vmem>>, vector<1x32xf32>
    %85 = vector.broadcast %84 : vector<1x32xf32> to vector<8x32xf32>
    %86 = arith.addf %83, %85 : vector<8x32xf32>
    %c0_58 = arith.constant 0 : index
    %c0_59 = arith.constant 0 : index
    %c0_60 = arith.constant 0 : index
    %87 = vector.load %arg10[%c0_58, %c0_59, %c0_60] : memref<1x8x32xf32, #tpu.memory_space<vmem>>, vector<1x8x32xf32>
    %88 = vector.shape_cast %87 : vector<1x8x32xf32> to vector<8x32xf32>
    %89 = vector.shape_cast %86 : vector<8x32xf32> to vector<1x8x32xf32>
    tpu.vector_store %arg10[%c0_58, %c0_59, %c0_60], %89 {strides = array<i32>} : memref<1x8x32xf32, #tpu.memory_space<vmem>>, vector<1x8x32xf32>,
    return
  }
  func.func @transform_0(%arg0: i32) -> (i32, i32, i32) {
    %c0_i32 = arith.constant 0 : i32
    %c0_i32_0 = arith.constant 0 : i32
    %c0_i32_1 = arith.constant 0 : i32
    return %arg0, %c0_i32, %c0_i32_0 : i32, i32, i32
  }
  func.func @transform_1(%arg0: i32) -> (i32, i32) {
    %c0_i32 = arith.constant 0 : i32
    %c0_i32_0 = arith.constant 0 : i32
    %c0_i32_1 = arith.constant 0 : i32
    return %c0_i32, %c0_i32_0 : i32, i32
  }
  func.func @transform_2(%arg0: i32) -> (i32, i32) {
    %c0_i32 = arith.constant 0 : i32
    %c0_i32_0 = arith.constant 0 : i32
    %c0_i32_1 = arith.constant 0 : i32
    return %c0_i32, %c0_i32_0 : i32, i32
  }
  func.func @transform_3(%arg0: i32) -> (i32, i32) {
    %c0_i32 = arith.constant 0 : i32
    %c0_i32_0 = arith.constant 0 : i32
    %c0_i32_1 = arith.constant 0 : i32
    return %c0_i32, %c0_i32_0 : i32, i32
  }
  func.func @transform_4(%arg0: i32) -> (i32, i32) {
    %c0_i32 = arith.constant 0 : i32
    %c0_i32_0 = arith.constant 0 : i32
    %c0_i32_1 = arith.constant 0 : i32
    return %c0_i32, %c0_i32_0 : i32, i32
  }
  func.func @transform_5(%arg0: i32) -> (i32, i32) {
    %c0_i32 = arith.constant 0 : i32
    %c0_i32_0 = arith.constant 0 : i32
    %c0_i32_1 = arith.constant 0 : i32
    return %c0_i32, %c0_i32_0 : i32, i32
  }
  func.func @transform_6(%arg0: i32) -> (i32, i32) {
    %c0_i32 = arith.constant 0 : i32
    %c0_i32_0 = arith.constant 0 : i32
    %c0_i32_1 = arith.constant 0 : i32
    return %c0_i32, %c0_i32_0 : i32, i32
  }
  func.func @transform_7(%arg0: i32) -> (i32, i32, i32) {
    %c0_i32 = arith.constant 0 : i32
    %c0_i32_0 = arith.constant 0 : i32
    %c0_i32_1 = arith.constant 0 : i32
    %c0_i32_2 = arith.constant 0 : i32
    return %c0_i32, %c0_i32_0, %c0_i32_1 : i32, i32, i32
  }
  func.func @transform_8(%arg0: i32) -> (i32, i32) {
    %c0_i32 = arith.constant 0 : i32
    %c0_i32_0 = arith.constant 0 : i32
    %c0_i32_1 = arith.constant 0 : i32
    return %c0_i32, %c0_i32_0 : i32, i32
  }
  func.func @transform_9(%arg0: i32) -> (i32, i32, i32) {
    %c0_i32 = arith.constant 0 : i32
    %c0_i32_0 = arith.constant 0 : i32
    %c0_i32_1 = arith.constant 0 : i32
    return %arg0, %c0_i32, %c0_i32_0 : i32, i32, i32
  }
}

</mosaic_0001>

<bundles_post_ra>
// kernel: tpu_custom_call.1
= control target key start
LH: loop header
LB: loop body
LE: loop exit
PB: predicated region body
PF: predicated region fallthrough
CT: control target
= control target key end

     0   :  { %s1756_s0 = inlined_call_operand.hbm [shape: f32[2,8,32], index: 0, kind: input, shape index: {}]   ;;  %s1757_s1 = inlined_call_operand.hbm [shape: bf16[32,32], index: 1, kind: input, shape index: {}]   ;;  %s1758_s2 = inlined_call_operand.vmem [shape: f32[1,32], index: 2, kind: input, shape index: {}]   ;;  %s1759_s3 = inlined_call_operand.hbm [shape: bf16[32,32], index: 3, kind: input, shape index: {}]   ;;  %s1760_s4 = inlined_call_operand.vmem [shape: f32[1,32], index: 4, kind: input, shape index: {}]   ;;  %s1761_s5 = inlined_call_operand.vmem [shape: bf16[32,32], index: 5, kind: input, shape index: {}]   ;;  %s1762_s6 = inlined_call_operand.vmem [shape: f32[1,32], index: 6, kind: input, shape index: {}]   ;;  %s1763_s7 = inlined_call_operand.hbm [shape: bf16[4,8,32], index: 7, kind: input, shape index: {}]   ;;  %s1764_s8 = inlined_call_operand.vmem [shape: f32[1,32], index: 8, kind: input, shape index: {}]   ;;  %s1765_s9 = inlined_call_operand.hbm [shape: f32[2,8,32], index: 9, kind: output, shape index: {}]  }
   0x1   :  { %1772 = sst [smem:[#allocation21_spill]] %s1765_s9 }
   0x2   :  { %14 = vsyncpa [#allocation7], 0 }
   0x3   :  { %16 = vsyncpa [#allocation7 + $0x1], 0 }
   0x4   :  { %17 = vsyncpa [#allocation10], 0 }
   0x5   :  { %18 = vsyncpa [#allocation13], 0 }
   0x6   :  { %19 = vsyncpa [#allocation8], 0 }
   0x7   :  { %21 = vsyncpa [#allocation8 + $0x1], 0  ;;  %s1428_s30 = smov 0   ;;  %s1430_s10 = smov 0  }
   0x8   :  { %s1432_s11 = smov 0   ;;  %s1434_s12 = smov 0  }
   0x9 LB: > { %1773 = sst [smem:[#allocation19_spill]] %s1346_s30  ;;  %s1449_s13 = sadd.s32 4294967295, %s1358_s12   ;;  %s1358_s12 = sphi %s1434_s12, %s1797_s12   ;;  %s1354_s11 = sphi %s1432_s11, %s1796_s11   ;;  %s1350_s10 = sphi %s1430_s10, %s1795_s10   ;;  %s1346_s30 = sphi %s1428_s30, %s1794_s30  }
   0xa   : > { %s961_s14 = sadd.s32 4294967294, %s1358_s12   ;;  %p47_p0 = scmp.ne.s32.totalorder %s1350_s10, %s1346_s30 }
   0xb   : > { %p1766_p1 = scmp.eq.s32.totalorder %s1449_s13, 0  ;;  %p245_p3 = scmp.eq.s32.totalorder %s961_s14, 1 }
   0xc   : > { %p962_p5 = scmp.ge.s32.totalorder %s1358_s12, 1  ;;  %p252_p7 = scmp.lt.s32.totalorder %s1358_s12, 3 }
   0xd   : > { %p1458_p4 = por %p1766_p1, %p47_p0  ;;  %p1463_p6 = por %p245_p3, %p47_p0 }
   0xe   : > { %p1468_p8 = pnand %p962_p5, %p252_p7  ;;  %s1364_s18 = smov [#allocation9]  }
   0xf   : > { %s1774_s15 = scalar_select %p1458_p4, 1, 0 }
  0x10   : > { %s1775_s16 = scalar_select %p1463_p6, 1, 0 }
  0x11   : > { %s1777_s17 = scalar_select %p1468_p8, 1, 0 }
  0x12   : > { %1776 = sst [smem:[#allocation20_spill]] %s1775_s16  ;;  %s264_s19 = sshll.u32 %s1364_s18, 4  ;;  %s1472_s19 = int_to_ptr.vmem [resolvable:$true] %s264_s19 }
  0x13   : > { %p1078_p9 = pneg %p1468_p8  ;;  %s1365_s21 = smov [#allocation11]  }
  0x14   : > { %s280_s22 = sshll.u32 %s1365_s21, 4  ;;  %s1366_s23 = smov [#allocation12]   ;;  %s1483_s22 = int_to_ptr.vmem [resolvable:$true] %s280_s22 }
  0x15   : > { %p1479_p11 = pnand %p1078_p9, %p1766_p1  ;;  %s1485_s24 = sshll.u32 %s1366_s23, 4  ;;  %s303_s24 = int_to_ptr.vmem [resolvable:$true] %s1485_s24 }
  0x16   : > { %s1166_s27 = scalar_lea.hbm %s1757_s1, 256 }
  0x17   : > { %p1167_p12 = scmp.ne.s32.totalorder %s1757_s1, %s1166_s27  ;;  %p1495_p13 = pneg %p1479_p11 }
  0x18   : > { %p1173_p5 = scmp.lt.u32.totalorder %s1166_s27, %s1757_s1 }
  0x19   : > { %p1169_p0 = pnand %p1495_p13, %p1167_p12 }
  0x1b   : > { %p1170_p3 = pneg %p1169_p0 }
  0x1d   : > { %p1175_p7 = pnand %p1173_p5, %p1170_p3 }
  0x1f   : > { %1178 = shalt.err (!%p1175_p7)
}
  0x20   : > { %s1179_s23 = scalar_lea.vmem %s1472_s19, 256  ;;  %p1187_p2 = scmp.lt.s32.totalorder %s1472_s19, %s1472_s19 }
  0x21   : > { %p1180_p9 = scmp.ne.s32.totalorder %s1472_s19, %s1179_s23  ;;  %p1188_p6 = scmp.lt.s32.totalorder %s1179_s23, %s1179_s23 }
  0x23   : > { %p1182_p10 = pnand %p1180_p9, %p1495_p13  ;;  %p1189_p12 = por %p1188_p6, %p1187_p2 }
  0x25   : > { %p1183_p1 = pneg %p1182_p10 }
  0x27   : > { %p1190_p0 = pnand %p1189_p12, %p1183_p1 }
  0x29   : > { %1193 = shalt.err (!%p1190_p0)
}
  0x2a   : > { %s1367_s25 = smov 64   ;;  %s1368_s26 = smov 4  }
  0x2b   : > { %1081 = dma.hbm_to_vmem [thread:$0]  (!%p1479_p11), %s1757_s1, 256, %s1472_s19, [#allocation10], %s1367_s25, %s1367_s25, %s1368_s26  }
  0x2c   : > { %s1194_s21 = scalar_lea.hbm %s1759_s3, 256 }
  0x2d   : > { %p1195_p1 = scmp.ne.s32.totalorder %s1759_s3, %s1194_s21  ;;  %p1201_p10 = scmp.lt.u32.totalorder %s1194_s21, %s1759_s3 }
  0x2f   : > { %p1197_p2 = pnand %p1195_p1, %p1495_p13 }
  0x31   : > { %p1198_p6 = pneg %p1197_p2 }
  0x33   : > { %p1203_p3 = pnand %p1201_p10, %p1198_p6 }
  0x35   : > { %1206 = shalt.err (!%p1203_p3)
}
  0x36   : > { %s1207_s19 = scalar_lea.vmem %s1483_s22, 256  ;;  %p1215_p12 = scmp.lt.s32.totalorder %s1483_s22, %s1483_s22 }
  0x37   : > { %p1208_p5 = scmp.ne.s32.totalorder %s1483_s22, %s1207_s19  ;;  %p1216_p0 = scmp.lt.s32.totalorder %s1207_s19, %s1207_s19 }
  0x39   : > { %p1210_p7 = pnand %p1208_p5, %p1495_p13  ;;  %p1217_p1 = por %p1216_p0, %p1215_p12 }
  0x3b   : > { %p1211_p9 = pneg %p1210_p7 }
  0x3d   : > { %p1218_p2 = pnand %p1217_p1, %p1211_p9 }
  0x3f   : > { %1221 = shalt.err (!%p1218_p2)
}
  0x40   : > { %1084 = dma.hbm_to_vmem [thread:$0]  (!%p1479_p11), %s1759_s3, 256, %s1483_s22, [#allocation10], %s1367_s25, %s1367_s25, %s1368_s26  }
  0x41   : > { %s1222_s28 = scalar_lea.hbm %s1763_s7, 256 }
  0x42   : > { %p1223_p6 = scmp.ne.s32.totalorder %s1763_s7, %s1222_s28  ;;  %p1229_p5 = scmp.lt.u32.totalorder %s1222_s28, %s1763_s7 }
  0x44   : > { %p1225_p10 = pnand %p1223_p6, %p1495_p13 }
  0x46   : > { %p1226_p3 = pneg %p1225_p10 }
  0x48   : > { %p1231_p7 = pnand %p1229_p5, %p1226_p3 }
  0x4a   : > { %1234 = shalt.err (!%p1231_p7)
}
  0x4b   : > { %s1235_s19 = scalar_lea.vmem %s303_s24, 256  ;;  %p1243_p1 = scmp.lt.s32.totalorder %s303_s24, %s303_s24 }
  0x4c   : > { %p1236_p9 = scmp.ne.s32.totalorder %s303_s24, %s1235_s19  ;;  %p1244_p2 = scmp.lt.s32.totalorder %s1235_s19, %s1235_s19 }
  0x4e   : > { %p1238_p12 = pnand %p1236_p9, %p1495_p13  ;;  %p1245_p4 = por %p1244_p2, %p1243_p1 }
  0x50   : > { %p1239_p0 = pneg %p1238_p12 }
  0x52   : > { %p1246_p8 = pnand %p1245_p4, %p1239_p0 }
  0x54   : > { %1249 = shalt.err (!%p1246_p8)
}
  0x55   : > { %1087 = dma.hbm_to_vmem [thread:$0]  (!%p1479_p11), %s1763_s7, 256, %s303_s24, [#allocation13], %s1367_s25, %s1367_s25, %s1368_s26  }
  0x56   : > { %s1568_s14 = sadd.s32 1, %s1358_s12   ;;  %s34_s30 = sadd.s32 1, %s1354_s11 }
  0x57   : > { %s31_s20 = ssub.s32 %s1358_s12, %s1568_s14  ;;  %p41_p8 = scmp.ne.s32.totalorder %s1354_s11, %s1350_s10 }
  0x58   : > { %p32_p4 = scmp.eq.s32.totalorder %s31_s20, 0  ;;  %p42_p13 = scmp.eq.s32.totalorder %s1358_s12, 0 }
  0x59   : > { %p1099_p6 = scmp.lt.s32.totalorder %s1358_s12, 2  ;;  %p1780_p3 = scmp.eq.s32.totalorder %s1449_s13, 1 }
  0x5a   : > { %s1578_s16 = scalar_select %p32_p4, %s1354_s11, %s34_s30  }
  0x5b   : > { %p43_p10 = por %p42_p13, %p41_p8  ;;  %p1582_p5 = por %p1780_p3, %p41_p8 }
  0x5c   : > { %s319_s28 = sand.u32 1, %s1354_s11   ;;  %s968_s29 = sshll.u32 %s1358_s12, 7 }
  0x5d   : > { %s967_s24 = sshll.u32 %s319_s28, 3  ;;  %s1591_s18 = scalar_lea.hbm %s1756_s0, %s968_s29 }
  0x5e   : > { %s323_s21 = scalar_lea.vmem [#allocation6], %s967_s24  ;;  %p1593_p11 = pnand %p1099_p6, %p43_p10 }
  0x5f   : > { %s330_s23 = sshll.u32 %s323_s21, 4  ;;  %s320_s22 = scalar_lea.sflag [#allocation7], %s319_s28  ;;  %s1597_s23 = int_to_ptr.vmem [resolvable:$true] %s330_s23 }
  0x60   : > { %s1250_s9 = scalar_lea.hbm %s1591_s18, 128  ;;  %p1252_p9 = pneg %p1593_p11 }
  0x61   : > { %p1251_p7 = scmp.ne.s32.totalorder %s1591_s18, %s1250_s9  ;;  %s1255_s29 = scalar_lea.hbm %s1756_s0, 256 }
  0x62   : > { %p1256_p1 = scmp.lt.u32.totalorder %s1591_s18, %s1756_s0  ;;  %p1257_p2 = scmp.lt.u32.totalorder %s1255_s29, %s1250_s9 }
  0x63   : > { %p1253_p12 = pnand %p1252_p9, %p1251_p7  ;;  %p1259_p8 = scmp.lt.u32.totalorder %s1250_s9, %s1591_s18 }
  0x64   : > { %p1258_p4 = por %p1257_p2, %p1256_p1 }
  0x65   : > { %p1254_p0 = pneg %p1253_p12 }
  0x66   : > { %p1260_p13 = por %p1259_p8, %p1258_p4 }
  0x68   : > { %p1261_p6 = pnand %p1260_p13, %p1254_p0 }
  0x6a   : > { %1264 = shalt.err (!%p1261_p6)
}
  0x6b   : > { %s1265_s28 = scalar_lea.vmem %s1597_s23, 128  ;;  %s1369_s26 = smov [#allocation6]  }
  0x6c   : > { %p1266_p10 = scmp.ne.s32.totalorder %s1597_s23, %s1265_s28  ;;  %s1270_s21 = sshll.u32 %s1369_s26, 4  ;;  %s1271_s21 = int_to_ptr.vmem [resolvable:$false] %s1270_s21 }
  0x6d   : > { %s1272_s20 = scalar_lea.vmem %s1271_s21, 256  ;;  %p1273_p12 = scmp.lt.s32.totalorder %s1597_s23, %s1271_s21 }
  0x6e   : > { %p1268_p3 = pnand %p1266_p10, %p1252_p9  ;;  %p1274_p1 = scmp.lt.s32.totalorder %s1272_s20, %s1265_s28 }
  0x70   : > { %p1269_p7 = pneg %p1268_p3  ;;  %p1275_p2 = por %p1274_p1, %p1273_p12 }
  0x72   : > { %p1276_p4 = pnand %p1275_p2, %p1269_p7 }
  0x74   : > { %1279 = shalt.err (!%p1276_p4)
}
  0x75   : > { %1091 = dma.hbm_to_vmem [thread:$0]  (!%p1593_p11), %s1591_s18, 128, %s1597_s23, %s320_s22  }
  0x76   : > { %p1783_p0 = scmp.ne.s32.totalorder %s1777_s17, 0 }
  0x77   : > { %s1627_s9 = sand.u32 (!%p1783_p0), 1, %s1350_s10   ;;  %p1784_p9 = scmp.ne.s32.totalorder (!%p1783_p0), %s1774_s15, 0 }
  0x78   : > { %339 = sbr.rel (%p1783_p0) target bundleno = 1334 (0x536), region = 56  ;;  %s970_s30 = sshll.u32 (!%p1783_p0), %s1627_s9, 3 }
  0x79   : > { %s342_s29 = scalar_lea.sflag (!%p1783_p0), [#allocation7], %s1627_s9  ;;  %s345_s24 = scalar_lea.vmem (!%p1783_p0), [#allocation6], %s970_s30 }
  0x7f   : > { %1329 = dma.done.wait (%p1784_p9), %s342_s29, 128  }
  0x80   : > { %1331 = vsyncadd (%p1784_p9), %s342_s29, 4294967168  ;;  %p1785_p11 = scmp.eq.s32.totalorder %s1449_s13, 0 }
  0x82   : > { %1333 = dma.done.wait (%p1785_p11), [#allocation10], 512   ;;  %p1786_p8 = pmov %p1785_p11 }
  0x84   : > { %1335 = vsyncadd (%p1786_p8), [#allocation10], 4294966784  ;;  %p1787_p13 = pmov %p1786_p8 }
  0x85   : > { %p1788_p6 = pmov %p1786_p8 }
  0x86   : > { %1337 = dma.done.wait (%p1787_p13), [#allocation13], 256  }
  0x87   : > { %1339 = vsyncadd (%p1788_p6), [#allocation13], 4294967040  ;;  %vm418_vm0 = vcmask 261120   ;;  %v1370_v0 = vmov 0.0   ;;  %vm1371_vm1 = vmmov 0   ;;  %v1156_v1 = vld [vmem:[#allocation9] sm:$0xff]  }
  0x88   : > { %1020 = vmatprep.subr.bf16.mxu0 %v1370_v0  ;;  %1028 = vmatprep.subr.bf16.mxu1 %v1370_v0  ;;  %650 = vst.msk [vmem:[#allocation5] sm:$0xff] %vm418_vm0, %v1370_v0  ;;  %v1157_v2 = vld [vmem:[#allocation11] sm:$0xff]   ;;  %v1158_v3 = vld [vmem:[#allocation9 + $0x8] sm:$0xff]   ;;  %v1159_v4 = vld [vmem:[#allocation11 + $0x8] sm:$0xff]   ;;  %vm590_vm2 = vcmask 60416   ;;  %s1372_s26 = smov 120  }
  0x89   : > { %1024 = vmatprep.mubr.msk.bf16.mxu0 %vm1371_vm1, %v1370_v0  ;;  %1032 = vmatprep.mubr.msk.bf16.mxu1 %vm1371_vm1, %v1370_v0  ;;  %v393_v5 = vld [vmem:[%s345_s24] sm:$0xff]  ;;  %v1161_v8 = vld [vmem:[%s1761_s5 + $0x8] sm:$0xff]   ;;  %s1373_s29 = smov 112   ;;  %s1374_s24 = smov 104  }
  0x8a   : > { %1021 = vmatpush3.bf16.msra.mxu0 %v1156_v1  ;;  %1029 = vmatpush3.bf16.msra.mxu1 %v1157_v2  ;;  %v394_v6 = vpack.c.bf16 %v393_v5, %v393_v5  ;;  %v1160_v7 = vld [vmem:[%s1761_s5] sm:$0xff]   ;;  %s1681_s15 = scalar_lea.vmem [#allocation14], %s970_s30  ;;  %s1683_s17 = smov 0  }
  0x8b   : > { %1022 = vmatprep.subr.bf16.mxu0 %v1370_v0  ;;  %1030 = vmatprep.subr.bf16.mxu1 %v1370_v0  ;;  %v975_v9 = vld [vmem:[%s1758_s2] ss:$0 sm:$0xff] }
  0x8c   : > { %v979_v10 = vld [vmem:[%s1760_s4] ss:$0 sm:$0xff] }
  0x8d   : > { %v983_v24 = vld [vmem:[%s1762_s6] ss:$0 sm:$0xff] }
  0x8e   : > { %1023 = vmatpush3.bf16.msra.mxu0 %v1158_v3  ;;  %1031 = vmatpush3.bf16.msra.mxu1 %v1159_v4 }
  0x8f   : > { %1036 = vmatprep.subr.bf16.mxu0 %v1370_v0 }
  0x91   : > { %1025 = vmatmul.mubr.msk.bf16.vlgmr.msra.gmra.mrb[0].mxu0 %vm418_vm0, %v394_v6  ;;  %1033 = vmatmul.mubr.msk.bf16.vlgmr.msra.gmra.mrb[0].mxu1 %vm418_vm0, %v394_v6 }
  0x92   : > { %1037 = vmatpush3.bf16.msra.mxu0 %v1160_v7  ;;  %1040 = vmatprep.mubr.msk.bf16.mxu0 %vm1371_vm1, %v1370_v0 }
  0x93   : > { %1038 = vmatprep.subr.bf16.mxu0 %v1370_v0 }
  0x96   : > { %1039 = vmatpush3.bf16.msra.mxu0 %v1161_v8 }
  0x99   : > { %1041 = vmatmul.mubr.msk.bf16.vlgmr.msra.gmra.mrb[4].mxu0 %vm418_vm0, %v394_v6 }
 0x164   : > { %v456_v11 = vpop.f32.mrb[0].mxu0  ;;  %v520_v13 = vpop.f32.mrb[0].mxu1 }
 0x165   : > { %v457_v12 = vadd.f32 %v975_v9, %v456_v11  ;;  %v1026_v14 = vpop.f32.mrb[1].mxu0  ;;  %v521_v15 = vadd.f32 %v979_v10, %v520_v13  ;;  %v1034_v16 = vpop.f32.mrb[1].mxu1 }
 0x166   : > { %v459_v17 = vpop.f32.mrb[2].mxu0  ;;  %v523_v19 = vpop.f32.mrb[2].mxu1 }
 0x167   : > { %v462_v18 = vmul.f32 0.35355338, %v457_v12  ;;  %v1027_v20 = vpop.f32.mrb[3].mxu0  ;;  %v592_v21 = vpack.c.bf16 %v521_v15, %v521_v15  ;;  %v1035_v22 = vpop.f32.mrb[3].mxu1 }
 0x169   : > { %v589_v23 = vpack.c.bf16 %v462_v18, %v462_v18  ;;  %593 = vst.msk [vmem:[#allocation3] sm:$0xf] %vm590_vm2, %v592_v21  ;;  %607 = vrot.lane.b32.xlu0 %v592_v21, %s1372_s26 }
 0x16b   : > { %591 = vst.msk [vmem:[#allocation2] sm:$0xf] %vm590_vm2, %v589_v23  ;;  %620 = vrot.lane.b32.xlu1 %v589_v23, %s1373_s29 }
 0x16c   : > { %v583_v25 = vpop.f32.mrb[4].mxu0 }
 0x16d   : > { %v584_v26 = vadd.f32 %v983_v24, %v583_v25  ;;  %v1042_v27 = vpop.f32.mrb[5].mxu0  ;;  %625 = vrot.lane.b32.xlu0 %v592_v21, %s1373_s29 }
 0x16e   : > { %v586_v28 = vpop.f32.mrb[6].mxu0 }
 0x16f   : > { %v594_v29 = vpack.c.bf16 %v584_v26, %v584_v26  ;;  %v1043_v30 = vpop.f32.mrb[7].mxu0 }
 0x171   : > { %595 = vst.msk [vmem:[#allocation4] sm:$0xf] %vm590_vm2, %v594_v29  ;;  %615 = vrot.lane.b32.xlu1 %v594_v29, %s1372_s26  ;;  %599 = vrot.lane.b32.xlu0 %v589_v23, %s1372_s26 }
 0x175   : > { %630 = vrot.lane.b32.xlu1 %v594_v29, %s1373_s29  ;;  %635 = vrot.lane.b32.xlu0 %v589_v23, %s1374_s24 }
 0x179   : > { %640 = vrot.lane.b32.xlu1 %v592_v21, %s1374_s24  ;;  %645 = vrot.lane.b32.xlu0 %v594_v29, %s1374_s24 }
 0x1db   : > { %v608_v31 = vpop.permute.xlu0 %607 }
 0x1dc   : > { %611 = vst.msk [vmem:[#allocation3 + $0x4] sm:$0xf] %vm590_vm2, %v608_v31 }
 0x1dd   : > { %v621_v32 = vpop.permute.xlu1 %620 }
 0x1de   : > { %624 = vst.msk [vmem:[#allocation2 + $0x8] sm:$0xf] %vm590_vm2, %v621_v32 }
 0x1df   : > { %v626_v33 = vpop.permute.xlu0 %625 }
 0x1e0   : > { %629 = vst.msk [vmem:[#allocation3 + $0x8] sm:$0xf] %vm590_vm2, %v626_v33 }
 0x1e3   : > { %v616_v34 = vpop.permute.xlu1 %615  ;;  %v600_v35 = vpop.permute.xlu0 %599 }
 0x1e4   : > { %619 = vst.msk [vmem:[#allocation4 + $0x4] sm:$0xf] %vm590_vm2, %v616_v34  ;;  %603 = vst.msk [vmem:[#allocation2 + $0x4] sm:$0xf] %vm590_vm2, %v600_v35 }
 0x1e7   : > { %v631_v36 = vpop.permute.xlu1 %630  ;;  %v636_v37 = vpop.permute.xlu0 %635 }
 0x1e8   : > { %634 = vst.msk [vmem:[#allocation4 + $0x8] sm:$0xf] %vm590_vm2, %v631_v36  ;;  %639 = vst.msk [vmem:[#allocation2 + $0xc] sm:$0xf] %vm590_vm2, %v636_v37 }
 0x1eb   : > { %v641_v38 = vpop.permute.xlu1 %640  ;;  %v646_v39 = vpop.permute.xlu0 %645 }
 0x1ec   : > { %644 = vst.msk [vmem:[#allocation3 + $0xc] sm:$0xf] %vm590_vm2, %v641_v38  ;;  %649 = vst.msk [vmem:[#allocation4 + $0xc] sm:$0xf] %vm590_vm2, %v646_v39 }
 0x1ed LB: >> { %v1375_v40 = vmov 0.0   ;;  %vm1376_vm3 = vmmov 0   ;;  %s990_s18 = sshll.u32 %s1362_s17, 2  ;;  %vm666_vm4 = vcmask 64512   ;;  %vm726_vm5 = vcmask 1043456   ;;  %v772_v3 = vld [vmem:[#allocation5] sm:$0xff]  ;;  %s1362_s17 = sphi %s1683_s17, %s656_s17  }
 0x1ee   : >> { %1044 = vmatprep.subr.bf16.mxu0 %v1375_v40  ;;  %1046 = vmatprep.mubr.msk.bf16.mxu0 %vm1376_vm3, %v1375_v40  ;;  %s661_s30 = scalar_lea.vmem [#allocation3], %s990_s18  ;;  %s658_s23 = scalar_lea.vmem [#allocation2], %s990_s18 }
 0x1ef   : >> { %1050 = vmatprep.subr.bf16.mxu1 %v1375_v40  ;;  %1052 = vmatprep.mubr.msk.bf16.mxu1 %vm1376_vm3, %v1375_v40  ;;  %v659_v43 = vld [vmem:[%s658_s23] sm:$0xf]  ;;  %s664_s19 = scalar_lea.vmem [#allocation4], %s990_s18  ;;  %s775_s22 = scalar_lea.vmem [#allocation12], %s990_s18 }
 0x1f0   : >> { %v776_v54 = vld [vmem:[%s775_s22] sm:$0xf]  ;;  %s656_s17 = sadd.s32 1, %s1362_s17  }
 0x1f1   : >> { %v781_v56 = vsel %vm726_vm5, %v776_v54, 0  ;;  %p653_p10 = scmp.ge.s32.totalorder %s656_s17, 4  }
 0x1f2   : > { %v997_v10 = vld [vmem:[%s1764_s8] ss:$0 sm:$0xff] (%p653_p10)  ;;  %s999_s26 = sshll.u32 (%p653_p10), %s1449_s13, 7  ;;  %s1789_s29 = sld [smem:[#allocation21_spill]] (%p653_p10) }
 0x1f3   : >> { %v662_v41 = vld [vmem:[%s661_s30] sm:$0xf]  ;;  %s849_s18 = sshll.u32 (%p653_p10), %s1681_s15, 4  ;;  %s836_s17 = scalar_lea.sflag (%p653_p10), [#allocation8], %s1627_s9  ;;  %s1712_s18 = int_to_ptr.vmem [resolvable:$true] %s849_s18 }
 0x1f4   : >> { %v671_v42 = vsel %vm666_vm4, %v662_v41, 0  ;;  %v665_v49 = vld [vmem:[%s664_s19] sm:$0xf]  ;;  %s1280_s30 = scalar_lea.vmem (%p653_p10), %s1712_s18, 128  ;;  %s1377_s13 = smov (%p653_p10), [#allocation14]  }
 0x1f5   : >> { %1045 = vmatpush3.bf16.xpose.msra.mxu0 %v671_v42  ;;  %v728_v50 = vsel %vm726_vm5, %v665_v49, 0  ;;  %p1281_p3 = scmp.ne.s32.totalorder (%p653_p10), %s1712_s18, %s1280_s30  ;;  %s1284_s23 = sshll.u32 (%p653_p10), %s1377_s13, 4  ;;  %s1285_s23 = int_to_ptr.vmem [resolvable:$false] %s1284_s23 }
 0x1f6   : >> { %1051 = vmatpush3.bf16.msra.mxu1 %v728_v50  ;;  %s1286_s19 = scalar_lea.vmem (%p653_p10), %s1285_s23, 256  ;;  %p1287_p1 = scmp.lt.s32.totalorder (%p653_p10), %s1712_s18, %s1285_s23 }
 0x1f7   : >> { %1056 = vmatprep.subr.bf16.mxu1 %v1375_v40  ;;  %p1282_p7 = pnand (%p653_p10), %p1281_p3, %p1582_p5  ;;  %p1288_p2 = scmp.lt.s32.totalorder (%p653_p10), %s1286_s19, %s1280_s30 }
 0x1f8   : > { %s1709_s24 = scalar_lea.hbm (%p653_p10), %s1789_s29, %s999_s26 }
 0x1f9   : > { %p1283_p12 = pneg (%p653_p10), %p1282_p7  ;;  %p1289_p4 = por (%p653_p10), %p1288_p2, %p1287_p1 }
 0x1fb   : > { %p1290_p0 = pnand (%p653_p10), %p1289_p4, %p1283_p12 }
 0x1fc   : >> { %1047 = vmatmul.mubr.msk.bf16.vlgmr.msra.gmra.mrb[0].mxu0 %vm666_vm4, %v659_v43 }
 0x2cf   : >> { %v707_v44 = vpop.f32.mrb[0].mxu0 }
 0x2d0   : >> { %v1048_v45 = vpop.f32.mrb[1].mxu0  ;;  %v713_v46 = vsel %vm666_vm4, %v707_v44, -inf }
 0x2d1   : >> { %714 = vmax.xlane.f32.xlu0 %v713_v46  ;;  %v710_v47 = vpop.f32.mrb[2].mxu0 }
 0x2d2   : >> { %v1049_v48 = vpop.f32.mrb[3].mxu0 }
 0x35e   : >> { %v715_v51 = vpop.xlane.xlu0 %714 }
 0x35f   : >> { %v716_v52 = vsub.f32 %v707_v44, %v715_v51 }
 0x361   : >> { %v717_v53 = vmul.f32 1.442695, %v716_v52 }
 0x363   : >> { %1162 = vpow2.f32 %v717_v53 }
 0x36d   : >> { %v1163_v55 = vpop.eup %1162 }
 0x36e   : >> { %v719_v57 = vsel %vm666_vm4, %v1163_v55, 0.0  ;;  %v722_v58 = vpack.c.bf16 %v1163_v55, %v1163_v55 }
 0x36f   : >> { %720 = vadd.xlane.f32.xlu0 %v719_v57 }
 0x370   : >> { %1053 = vmatmul.mubr.msk.bf16.vlgmr.msra.gmra.mrb[0].mxu1 %vm666_vm4, %v722_v58 }
 0x371   : >> { %1057 = vmatpush3.bf16.msra.mxu1 %v781_v56  ;;  %1058 = vmatprep.mubr.msk.bf16.mxu1 %vm1376_vm3, %v1375_v40 }
 0x3fc   : >> { %v721_v59 = vpop.xlane.xlu0 %720 }
 0x3fd   : >> { %1164 = vrcp.f32 %v721_v59 }
 0x407   : >> { %v1165_v60 = vpop.eup %1164 }
 0x443   : >> { %v764_v61 = vpop.f32.mrb[0].mxu1 }
 0x444   : >> { %v771_v62 = vmul.f32 %v1165_v60, %v764_v61  ;;  %v1054_v63 = vpop.f32.mrb[1].mxu1 }
 0x445   : >> { %v767_v0 = vpop.f32.mrb[2].mxu1 }
 0x446   : >> { %v773_v1 = vpack.c.bf16 %v771_v62, %v771_v62  ;;  %v1055_v2 = vpop.f32.mrb[3].mxu1 }
 0x448   : >> { %1059 = vmatmul.mubr.msk.bf16.vlgmr.msra.gmra.mrb[4].mxu1 %vm666_vm4, %v773_v1 }
 0x518   : > { %655 = sbr.rel (!%p653_p10) target bundleno = 493 (0x1ed), region = 133 }
 0x51b   : >> { %v817_v4 = vpop.f32.mrb[4].mxu1 }
 0x51c   : >> { %v823_v5 = vadd.f32 %v817_v4, %v772_v3  ;;  %v1060_v6 = vpop.f32.mrb[5].mxu1 }
 0x51d   : >> { %v820_v7 = vpop.f32.mrb[6].mxu1 }
 0x51e   : >> { %824 = vst.msk [vmem:[#allocation5] sm:$0xff] %vm418_vm0, %v823_v5  ;;  %v1061_v8 = vpop.f32.mrb[7].mxu1 }
 0x525   : > { %v825_v9 = vld [vmem:[#allocation5] sm:$0xff] }
 0x526   : > { %v833_v11 = vadd.f32 %v997_v10, %v825_v9 }
 0x528   : > { %834 = vst.msk [vmem:[%s1681_s15] sm:$0xff] %vm418_vm0, %v833_v11 }
 0x529   : > { %1293 = shalt.err (!%p1290_p0)
}
 0x52a   : > { %s1294_s9 = scalar_lea.hbm %s1709_s24, 128  ;;  %s1298_s25 = scalar_lea.hbm %s1789_s29, 256 }
 0x52b   : > { %p1295_p9 = scmp.ne.s32.totalorder %s1709_s24, %s1294_s9  ;;  %p1299_p13 = scmp.lt.u32.totalorder %s1709_s24, %s1789_s29 }
 0x52c   : > { %p1300_p6 = scmp.lt.u32.totalorder %s1298_s25, %s1294_s9  ;;  %p1302_p3 = scmp.lt.u32.totalorder %s1294_s9, %s1709_s24 }
 0x52d   : > { %p1296_p11 = pnand %p1295_p9, %p1582_p5 }
 0x52e   : > { %p1301_p10 = por %p1300_p6, %p1299_p13 }
 0x52f   : > { %p1297_p8 = pneg %p1296_p11 }
 0x530   : > { %p1303_p7 = por %p1302_p3, %p1301_p10 }
 0x532   : > { %p1304_p12 = pnand %p1303_p7, %p1297_p8 }
 0x534   : > { %1307 = shalt.err (!%p1304_p12)
}
 0x535   : > { %1076 = dma.vmem_to_hbm [thread:$0]  (%p1582_p5), %s1712_s18, 128, %s1709_s24, %s836_s17  }
 0x536 PF: > { %s1790_s21 = sld [smem:[#allocation19_spill]]  ;;  %s1791_s20 = sld [smem:[#allocation20_spill]] }
 0x537   : > { %p1793_p2 = scmp.ge.s32.totalorder %s1358_s12, 2 }
 0x53c   : > { %s861_s30 = sand.u32 1, %s1790_s21   ;;  %p1792_p1 = scmp.ne.s32.totalorder %s1791_s20, 0 }
 0x53d   : > { %s862_s13 = scalar_lea.sflag [#allocation8], %s861_s30 }
 0x53e   : > { %p1093_p4 = pnand %p1793_p2, %p1792_p1 }
 0x540   : > { %1341 = dma.done.wait (!%p1093_p4), %s862_s13, 128  }
 0x541   : > { %1343 = vsyncadd (!%p1093_p4), %s862_s13, 4294967168  ;;  %p24_p0 = scmp.ge.s32.totalorder %s1568_s14, 4   ;;  %s1794_s30 = smov %s1350_s10 }
 0x542   : > { %s1795_s10 = smov %s1354_s11  ;;  %s1796_s11 = smov %s1578_s16 }
 0x543   : > { %s1797_s12 = smov %s1568_s14  ;;  %26 = sbr.rel (!%p24_p0) target bundleno = 9 (0x9), region = 144 }
 0x54a   :  { %867 = vsyncpa [#allocation7], 1 }
 0x54b   :  { %869 = vsyncpa [#allocation7 + $0x1], 1 }
 0x54c   :  { %870 = vsyncpa [#allocation10], 1 }
 0x54d   :  { %871 = vsyncpa [#allocation13], 1 }
 0x54e   :  { %872 = vsyncpa [#allocation8], 1 }
 0x54f   :  { %874 = vsyncpa [#allocation8 + $0x1], 1 }

// kernel: tpu_custom_call.1
= control target key start
LH: loop header
LB: loop body
LE: loop exit
PB: predicated region body
PF: predicated region fallthrough
CT: control target
= control target key end

     0   :  { %s1756_s0 = inlined_call_operand.hbm [shape: f32[2,8,32], index: 0, kind: input, shape index: {}]   ;;  %s1757_s1 = inlined_call_operand.hbm [shape: bf16[32,32], index: 1, kind: input, shape index: {}]   ;;  %s1758_s2 = inlined_call_operand.vmem [shape: f32[1,32], index: 2, kind: input, shape index: {}]   ;;  %s1759_s3 = inlined_call_operand.hbm [shape: bf16[32,32], index: 3, kind: input, shape index: {}]   ;;  %s1760_s4 = inlined_call_operand.vmem [shape: f32[1,32], index: 4, kind: input, shape index: {}]   ;;  %s1761_s5 = inlined_call_operand.vmem [shape: bf16[32,32], index: 5, kind: input, shape index: {}]   ;;  %s1762_s6 = inlined_call_operand.vmem [shape: f32[1,32], index: 6, kind: input, shape index: {}]   ;;  %s1763_s7 = inlined_call_operand.hbm [shape: bf16[4,8,32], index: 7, kind: input, shape index: {}]   ;;  %s1764_s8 = inlined_call_operand.vmem [shape: f32[1,32], index: 8, kind: input, shape index: {}]   ;;  %s1765_s9 = inlined_call_operand.hbm [shape: f32[2,8,32], index: 9, kind: output, shape index: {}]  }
   0x1   :  { %1772 = sst [smem:[#allocation21_spill]] %s1765_s9 }
   0x2   :  { %14 = vsyncpa [#allocation7], 0 }
   0x3   :  { %16 = vsyncpa [#allocation7 + $0x1], 0 }
   0x4   :  { %17 = vsyncpa [#allocation10], 0 }
   0x5   :  { %18 = vsyncpa [#allocation13], 0 }
   0x6   :  { %19 = vsyncpa [#allocation8], 0 }
   0x7   :  { %21 = vsyncpa [#allocation8 + $0x1], 0  ;;  %s1428_s30 = smov 0   ;;  %s1430_s10 = smov 0  }
   0x8   :  { %s1432_s11 = smov 0   ;;  %s1434_s12 = smov 0  }
   0x9 LB: > { %1773 = sst [smem:[#allocation19_spill]] %s1346_s30  ;;  %s1449_s13 = sadd.s32 4294967295, %s1358_s12   ;;  %s1358_s12 = sphi %s1434_s12, %s1797_s12   ;;  %s1354_s11 = sphi %s1432_s11, %s1796_s11   ;;  %s1350_s10 = sphi %s1430_s10, %s1795_s10   ;;  %s1346_s30 = sphi %s1428_s30, %s1794_s30  }
   0xa   : > { %s961_s14 = sadd.s32 4294967294, %s1358_s12   ;;  %p47_p0 = scmp.ne.s32.totalorder %s1350_s10, %s1346_s30 }
   0xb   : > { %p1766_p1 = scmp.eq.s32.totalorder %s1449_s13, 0  ;;  %p245_p3 = scmp.eq.s32.totalorder %s961_s14, 1 }
   0xc   : > { %p962_p5 = scmp.ge.s32.totalorder %s1358_s12, 1  ;;  %p252_p7 = scmp.lt.s32.totalorder %s1358_s12, 3 }
   0xd   : > { %p1458_p4 = por %p1766_p1, %p47_p0  ;;  %p1463_p6 = por %p245_p3, %p47_p0 }
   0xe   : > { %p1468_p8 = pnand %p962_p5, %p252_p7  ;;  %s1364_s18 = smov [#allocation9]  }
   0xf   : > { %s1774_s15 = scalar_select %p1458_p4, 1, 0 }
  0x10   : > { %s1775_s16 = scalar_select %p1463_p6, 1, 0 }
  0x11   : > { %s1777_s17 = scalar_select %p1468_p8, 1, 0 }
  0x12   : > { %1776 = sst [smem:[#allocation20_spill]] %s1775_s16  ;;  %s264_s19 = sshll.u32 %s1364_s18, 4  ;;  %s1472_s19 = int_to_ptr.vmem [resolvable:$true] %s264_s19 }
  0x13   : > { %p1078_p9 = pneg %p1468_p8  ;;  %s1365_s21 = smov [#allocation11]  }
  0x14   : > { %s280_s22 = sshll.u32 %s1365_s21, 4  ;;  %s1366_s23 = smov [#allocation12]   ;;  %s1483_s22 = int_to_ptr.vmem [resolvable:$true] %s280_s22 }
  0x15   : > { %p1479_p11 = pnand %p1078_p9, %p1766_p1  ;;  %s1485_s24 = sshll.u32 %s1366_s23, 4  ;;  %s303_s24 = int_to_ptr.vmem [resolvable:$true] %s1485_s24 }
  0x16   : > { %s1166_s27 = scalar_lea.hbm %s1757_s1, 256 }
  0x17   : > { %p1167_p12 = scmp.ne.s32.totalorder %s1757_s1, %s1166_s27  ;;  %p1495_p13 = pneg %p1479_p11 }
  0x18   : > { %p1173_p5 = scmp.lt.u32.totalorder %s1166_s27, %s1757_s1 }
  0x19   : > { %p1169_p0 = pnand %p1495_p13, %p1167_p12 }
  0x1b   : > { %p1170_p3 = pneg %p1169_p0 }
  0x1d   : > { %p1175_p7 = pnand %p1173_p5, %p1170_p3 }
  0x1f   : > { %1178 = shalt.err (!%p1175_p7)
}
  0x20   : > { %s1179_s23 = scalar_lea.vmem %s1472_s19, 256  ;;  %p1187_p2 = scmp.lt.s32.totalorder %s1472_s19, %s1472_s19 }
  0x21   : > { %p1180_p9 = scmp.ne.s32.totalorder %s1472_s19, %s1179_s23  ;;  %p1188_p6 = scmp.lt.s32.totalorder %s1179_s23, %s1179_s23 }
  0x23   : > { %p1182_p10 = pnand %p1180_p9, %p1495_p13  ;;  %p1189_p12 = por %p1188_p6, %p1187_p2 }
  0x25   : > { %p1183_p1 = pneg %p1182_p10 }
  0x27   : > { %p1190_p0 = pnand %p1189_p12, %p1183_p1 }
  0x29   : > { %1193 = shalt.err (!%p1190_p0)
}
  0x2a   : > { %s1367_s25 = smov 64   ;;  %s1368_s26 = smov 4  }
  0x2b   : > { %1081 = dma.hbm_to_vmem [thread:$0]  (!%p1479_p11), %s1757_s1, 256, %s1472_s19, [#allocation10], %s1367_s25, %s1367_s25, %s1368_s26  }
  0x2c   : > { %s1194_s21 = scalar_lea.hbm %s1759_s3, 256 }
  0x2d   : > { %p1195_p1 = scmp.ne.s32.totalorder %s1759_s3, %s1194_s21  ;;  %p1201_p10 = scmp.lt.u32.totalorder %s1194_s21, %s1759_s3 }
  0x2f   : > { %p1197_p2 = pnand %p1195_p1, %p1495_p13 }
  0x31   : > { %p1198_p6 = pneg %p1197_p2 }
  0x33   : > { %p1203_p3 = pnand %p1201_p10, %p1198_p6 }
  0x35   : > { %1206 = shalt.err (!%p1203_p3)
}
  0x36   : > { %s1207_s19 = scalar_lea.vmem %s1483_s22, 256  ;;  %p1215_p12 = scmp.lt.s32.totalorder %s1483_s22, %s1483_s22 }
  0x37   : > { %p1208_p5 = scmp.ne.s32.totalorder %s1483_s22, %s1207_s19  ;;  %p1216_p0 = scmp.lt.s32.totalorder %s1207_s19, %s1207_s19 }
  0x39   : > { %p1210_p7 = pnand %p1208_p5, %p1495_p13  ;;  %p1217_p1 = por %p1216_p0, %p1215_p12 }
  0x3b   : > { %p1211_p9 = pneg %p1210_p7 }
  0x3d   : > { %p1218_p2 = pnand %p1217_p1, %p1211_p9 }
  0x3f   : > { %1221 = shalt.err (!%p1218_p2)
}
  0x40   : > { %1084 = dma.hbm_to_vmem [thread:$0]  (!%p1479_p11), %s1759_s3, 256, %s1483_s22, [#allocation10], %s1367_s25, %s1367_s25, %s1368_s26  }
  0x41   : > { %s1222_s28 = scalar_lea.hbm %s1763_s7, 256 }
  0x42   : > { %p1223_p6 = scmp.ne.s32.totalorder %s1763_s7, %s1222_s28  ;;  %p1229_p5 = scmp.lt.u32.totalorder %s1222_s28, %s1763_s7 }
  0x44   : > { %p1225_p10 = pnand %p1223_p6, %p1495_p13 }
  0x46   : > { %p1226_p3 = pneg %p1225_p10 }
  0x48   : > { %p1231_p7 = pnand %p1229_p5, %p1226_p3 }
  0x4a   : > { %1234 = shalt.err (!%p1231_p7)
}
  0x4b   : > { %s1235_s19 = scalar_lea.vmem %s303_s24, 256  ;;  %p1243_p1 = scmp.lt.s32.totalorder %s303_s24, %s303_s24 }
  0x4c   : > { %p1236_p9 = scmp.ne.s32.totalorder %s303_s24, %s1235_s19  ;;  %p1244_p2 = scmp.lt.s32.totalorder %s1235_s19, %s1235_s19 }
  0x4e   : > { %p1238_p12 = pnand %p1236_p9, %p1495_p13  ;;  %p1245_p4 = por %p1244_p2, %p1243_p1 }
  0x50   : > { %p1239_p0 = pneg %p1238_p12 }
  0x52   : > { %p1246_p8 = pnand %p1245_p4, %p1239_p0 }
  0x54   : > { %1249 = shalt.err (!%p1246_p8)
}
  0x55   : > { %1087 = dma.hbm_to_vmem [thread:$0]  (!%p1479_p11), %s1763_s7, 256, %s303_s24, [#allocation13], %s1367_s25, %s1367_s25, %s1368_s26  }
  0x56   : > { %s1568_s14 = sadd.s32 1, %s1358_s12   ;;  %s34_s30 = sadd.s32 1, %s1354_s11 }
  0x57   : > { %s31_s20 = ssub.s32 %s1358_s12, %s1568_s14  ;;  %p41_p8 = scmp.ne.s32.totalorder %s1354_s11, %s1350_s10 }
  0x58   : > { %p32_p4 = scmp.eq.s32.totalorder %s31_s20, 0  ;;  %p42_p13 = scmp.eq.s32.totalorder %s1358_s12, 0 }
  0x59   : > { %p1099_p6 = scmp.lt.s32.totalorder %s1358_s12, 2  ;;  %p1780_p3 = scmp.eq.s32.totalorder %s1449_s13, 1 }
  0x5a   : > { %s1578_s16 = scalar_select %p32_p4, %s1354_s11, %s34_s30  }
  0x5b   : > { %p43_p10 = por %p42_p13, %p41_p8  ;;  %p1582_p5 = por %p1780_p3, %p41_p8 }
  0x5c   : > { %s319_s28 = sand.u32 1, %s1354_s11   ;;  %s968_s29 = sshll.u32 %s1358_s12, 7 }
  0x5d   : > { %s967_s24 = sshll.u32 %s319_s28, 3  ;;  %s1591_s18 = scalar_lea.hbm %s1756_s0, %s968_s29 }
  0x5e   : > { %s323_s21 = scalar_lea.vmem [#allocation6], %s967_s24  ;;  %p1593_p11 = pnand %p1099_p6, %p43_p10 }
  0x5f   : > { %s330_s23 = sshll.u32 %s323_s21, 4  ;;  %s320_s22 = scalar_lea.sflag [#allocation7], %s319_s28  ;;  %s1597_s23 = int_to_ptr.vmem [resolvable:$true] %s330_s23 }
  0x60   : > { %s1250_s9 = scalar_lea.hbm %s1591_s18, 128  ;;  %p1252_p9 = pneg %p1593_p11 }
  0x61   : > { %p1251_p7 = scmp.ne.s32.totalorder %s1591_s18, %s1250_s9  ;;  %s1255_s29 = scalar_lea.hbm %s1756_s0, 256 }
  0x62   : > { %p1256_p1 = scmp.lt.u32.totalorder %s1591_s18, %s1756_s0  ;;  %p1257_p2 = scmp.lt.u32.totalorder %s1255_s29, %s1250_s9 }
  0x63   : > { %p1253_p12 = pnand %p1252_p9, %p1251_p7  ;;  %p1259_p8 = scmp.lt.u32.totalorder %s1250_s9, %s1591_s18 }
  0x64   : > { %p1258_p4 = por %p1257_p2, %p1256_p1 }
  0x65   : > { %p1254_p0 = pneg %p1253_p12 }
  0x66   : > { %p1260_p13 = por %p1259_p8, %p1258_p4 }
  0x68   : > { %p1261_p6 = pnand %p1260_p13, %p1254_p0 }
  0x6a   : > { %1264 = shalt.err (!%p1261_p6)
}
  0x6b   : > { %s1265_s28 = scalar_lea.vmem %s1597_s23, 128  ;;  %s1369_s26 = smov [#allocation6]  }
  0x6c   : > { %p1266_p10 = scmp.ne.s32.totalorder %s1597_s23, %s1265_s28  ;;  %s1270_s21 = sshll.u32 %s1369_s26, 4  ;;  %s1271_s21 = int_to_ptr.vmem [resolvable:$false] %s1270_s21 }
  0x6d   : > { %s1272_s20 = scalar_lea.vmem %s1271_s21, 256  ;;  %p1273_p12 = scmp.lt.s32.totalorder %s1597_s23, %s1271_s21 }
  0x6e   : > { %p1268_p3 = pnand %p1266_p10, %p1252_p9  ;;  %p1274_p1 = scmp.lt.s32.totalorder %s1272_s20, %s1265_s28 }
  0x70   : > { %p1269_p7 = pneg %p1268_p3  ;;  %p1275_p2 = por %p1274_p1, %p1273_p12 }
  0x72   : > { %p1276_p4 = pnand %p1275_p2, %p1269_p7 }
  0x74   : > { %1279 = shalt.err (!%p1276_p4)
}
  0x75   : > { %1091 = dma.hbm_to_vmem [thread:$0]  (!%p1593_p11), %s1591_s18, 128, %s1597_s23, %s320_s22  }
  0x76   : > { %p1783_p0 = scmp.ne.s32.totalorder %s1777_s17, 0 }
  0x77   : > { %s1627_s9 = sand.u32 (!%p1783_p0), 1, %s1350_s10   ;;  %p1784_p9 = scmp.ne.s32.totalorder (!%p1783_p0), %s1774_s15, 0 }
  0x78   : > { %339 = sbr.rel (%p1783_p0) target bundleno = 1334 (0x536), region = 56  ;;  %s970_s30 = sshll.u32 (!%p1783_p0), %s1627_s9, 3 }
  0x79   : > { %s342_s29 = scalar_lea.sflag (!%p1783_p0), [#allocation7], %s1627_s9  ;;  %s345_s24 = scalar_lea.vmem (!%p1783_p0), [#allocation6], %s970_s30 }
  0x7f   : > { %1329 = dma.done.wait (%p1784_p9), %s342_s29, 128  }
  0x80   : > { %1331 = vsyncadd (%p1784_p9), %s342_s29, 4294967168  ;;  %p1785_p11 = scmp.eq.s32.totalorder %s1449_s13, 0 }
  0x82   : > { %1333 = dma.done.wait (%p1785_p11), [#allocation10], 512   ;;  %p1786_p8 = pmov %p1785_p11 }
  0x84   : > { %1335 = vsyncadd (%p1786_p8), [#allocation10], 4294966784  ;;  %p1787_p13 = pmov %p1786_p8 }
  0x85   : > { %p1788_p6 = pmov %p1786_p8 }
  0x86   : > { %1337 = dma.done.wait (%p1787_p13), [#allocation13], 256  }
  0x87   : > { %1339 = vsyncadd (%p1788_p6), [#allocation13], 4294967040  ;;  %vm418_vm0 = vcmask 261120   ;;  %v1370_v0 = vmov 0.0   ;;  %vm1371_vm1 = vmmov 0   ;;  %v1156_v1 = vld [vmem:[#allocation9] sm:$0xff]  }
  0x88   : > { %1020 = vmatprep.subr.bf16.mxu0 %v1370_v0  ;;  %1028 = vmatprep.subr.bf16.mxu1 %v1370_v0  ;;  %650 = vst.msk [vmem:[#allocation5] sm:$0xff] %vm418_vm0, %v1370_v0  ;;  %v1157_v2 = vld [vmem:[#allocation11] sm:$0xff]   ;;  %v1158_v3 = vld [vmem:[#allocation9 + $0x8] sm:$0xff]   ;;  %v1159_v4 = vld [vmem:[#allocation11 + $0x8] sm:$0xff]   ;;  %vm590_vm2 = vcmask 60416   ;;  %s1372_s26 = smov 120  }
  0x89   : > { %1024 = vmatprep.mubr.msk.bf16.mxu0 %vm1371_vm1, %v1370_v0  ;;  %1032 = vmatprep.mubr.msk.bf16.mxu1 %vm1371_vm1, %v1370_v0  ;;  %v393_v5 = vld [vmem:[%s345_s24] sm:$0xff]  ;;  %v1161_v8 = vld [vmem:[%s1761_s5 + $0x8] sm:$0xff]   ;;  %s1373_s29 = smov 112   ;;  %s1374_s24 = smov 104  }
  0x8a   : > { %1021 = vmatpush3.bf16.msra.mxu0 %v1156_v1  ;;  %1029 = vmatpush3.bf16.msra.mxu1 %v1157_v2  ;;  %v394_v6 = vpack.c.bf16 %v393_v5, %v393_v5  ;;  %v1160_v7 = vld [vmem:[%s1761_s5] sm:$0xff]   ;;  %s1681_s15 = scalar_lea.vmem [#allocation14], %s970_s30  ;;  %s1683_s17 = smov 0  }
  0x8b   : > { %1022 = vmatprep.subr.bf16.mxu0 %v1370_v0  ;;  %1030 = vmatprep.subr.bf16.mxu1 %v1370_v0  ;;  %v975_v9 = vld [vmem:[%s1758_s2] ss:$0 sm:$0xff] }
  0x8c   : > { %v979_v10 = vld [vmem:[%s1760_s4] ss:$0 sm:$0xff] }
  0x8d   : > { %v983_v24 = vld [vmem:[%s1762_s6] ss:$0 sm:$0xff] }
  0x8e   : > { %1023 = vmatpush3.bf16.msra.mxu0 %v1158_v3  ;;  %1031 = vmatpush3.bf16.msra.mxu1 %v1159_v4 }
  0x8f   : > { %1036 = vmatprep.subr.bf16.mxu0 %v1370_v0 }
  0x91   : > { %1025 = vmatmul.mubr.msk.bf16.vlgmr.msra.gmra.mrb[0].mxu0 %vm418_vm0, %v394_v6  ;;  %1033 = vmatmul.mubr.msk.bf16.vlgmr.msra.gmra.mrb[0].mxu1 %vm418_vm0, %v394_v6 }
  0x92   : > { %1037 = vmatpush3.bf16.msra.mxu0 %v1160_v7  ;;  %1040 = vmatprep.mubr.msk.bf16.mxu0 %vm1371_vm1, %v1370_v0 }
  0x93   : > { %1038 = vmatprep.subr.bf16.mxu0 %v1370_v0 }
  0x96   : > { %1039 = vmatpush3.bf16.msra.mxu0 %v1161_v8 }
  0x99   : > { %1041 = vmatmul.mubr.msk.bf16.vlgmr.msra.gmra.mrb[4].mxu0 %vm418_vm0, %v394_v6 }
 0x164   : > { %v456_v11 = vpop.f32.mrb[0].mxu0  ;;  %v520_v13 = vpop.f32.mrb[0].mxu1 }
 0x165   : > { %v457_v12 = vadd.f32 %v975_v9, %v456_v11  ;;  %v1026_v14 = vpop.f32.mrb[1].mxu0  ;;  %v521_v15 = vadd.f32 %v979_v10, %v520_v13  ;;  %v1034_v16 = vpop.f32.mrb[1].mxu1 }
 0x166   : > { %v459_v17 = vpop.f32.mrb[2].mxu0  ;;  %v523_v19 = vpop.f32.mrb[2].mxu1 }
 0x167   : > { %v462_v18 = vmul.f32 0.35355338, %v457_v12  ;;  %v1027_v20 = vpop.f32.mrb[3].mxu0  ;;  %v592_v21 = vpack.c.bf16 %v521_v15, %v521_v15  ;;  %v1035_v22 = vpop.f32.mrb[3].mxu1 }
 0x169   : > { %v589_v23 = vpack.c.bf16 %v462_v18, %v462_v18  ;;  %593 = vst.msk [vmem:[#allocation3] sm:$0xf] %vm590_vm2, %v592_v21  ;;  %607 = vrot.lane.b32.xlu0 %v592_v21, %s1372_s26 }
 0x16b   : > { %591 = vst.msk [vmem:[#allocation2] sm:$0xf] %vm590_vm2, %v589_v23  ;;  %620 = vrot.lane.b32.xlu1 %v589_v23, %s1373_s29 }
 0x16c   : > { %v583_v25 = vpop.f32.mrb[4].mxu0 }
 0x16d   : > { %v584_v26 = vadd.f32 %v983_v24, %v583_v25  ;;  %v1042_v27 = vpop.f32.mrb[5].mxu0  ;;  %625 = vrot.lane.b32.xlu0 %v592_v21, %s1373_s29 }
 0x16e   : > { %v586_v28 = vpop.f32.mrb[6].mxu0 }
 0x16f   : > { %v594_v29 = vpack.c.bf16 %v584_v26, %v584_v26  ;;  %v1043_v30 = vpop.f32.mrb[7].mxu0 }
 0x171   : > { %595 = vst.msk [vmem:[#allocation4] sm:$0xf] %vm590_vm2, %v594_v29  ;;  %615 = vrot.lane.b32.xlu1 %v594_v29, %s1372_s26  ;;  %599 = vrot.lane.b32.xlu0 %v589_v23, %s1372_s26 }
 0x175   : > { %630 = vrot.lane.b32.xlu1 %v594_v29, %s1373_s29  ;;  %635 = vrot.lane.b32.xlu0 %v589_v23, %s1374_s24 }
 0x179   : > { %640 = vrot.lane.b32.xlu1 %v592_v21, %s1374_s24  ;;  %645 = vrot.lane.b32.xlu0 %v594_v29, %s1374_s24 }
 0x1db   : > { %v608_v31 = vpop.permute.xlu0 %607 }
 0x1dc   : > { %611 = vst.msk [vmem:[#allocation3 + $0x4] sm:$0xf] %vm590_vm2, %v608_v31 }
 0x1dd   : > { %v621_v32 = vpop.permute.xlu1 %620 }
 0x1de   : > { %624 = vst.msk [vmem:[#allocation2 + $0x8] sm:$0xf] %vm590_vm2, %v621_v32 }
 0x1df   : > { %v626_v33 = vpop.permute.xlu0 %625 }
 0x1e0   : > { %629 = vst.msk [vmem:[#allocation3 + $0x8] sm:$0xf] %vm590_vm2, %v626_v33 }
 0x1e3   : > { %v616_v34 = vpop.permute.xlu1 %615  ;;  %v600_v35 = vpop.permute.xlu0 %599 }
 0x1e4   : > { %619 = vst.msk [vmem:[#allocation4 + $0x4] sm:$0xf] %vm590_vm2, %v616_v34  ;;  %603 = vst.msk [vmem:[#allocation2 + $0x4] sm:$0xf] %vm590_vm2, %v600_v35 }
 0x1e7   : > { %v631_v36 = vpop.permute.xlu1 %630  ;;  %v636_v37 = vpop.permute.xlu0 %635 }
 0x1e8   : > { %634 = vst.msk [vmem:[#allocation4 + $0x8] sm:$0xf] %vm590_vm2, %v631_v36  ;;  %639 = vst.msk [vmem:[#allocation2 + $0xc] sm:$0xf] %vm590_vm2, %v636_v37 }
 0x1eb   : > { %v641_v38 = vpop.permute.xlu1 %640  ;;  %v646_v39 = vpop.permute.xlu0 %645 }
 0x1ec   : > { %644 = vst.msk [vmem:[#allocation3 + $0xc] sm:$0xf] %vm590_vm2, %v641_v38  ;;  %649 = vst.msk [vmem:[#allocation4 + $0xc] sm:$0xf] %vm590_vm2, %v646_v39 }
 0x1ed LB: >> { %v1375_v40 = vmov 0.0   ;;  %vm1376_vm3 = vmmov 0   ;;  %s990_s18 = sshll.u32 %s1362_s17, 2  ;;  %vm666_vm4 = vcmask 64512   ;;  %vm726_vm5 = vcmask 1043456   ;;  %v772_v3 = vld [vmem:[#allocation5] sm:$0xff]  ;;  %s1362_s17 = sphi %s1683_s17, %s656_s17  }
 0x1ee   : >> { %1044 = vmatprep.subr.bf16.mxu0 %v1375_v40  ;;  %1046 = vmatprep.mubr.msk.bf16.mxu0 %vm1376_vm3, %v1375_v40  ;;  %s661_s30 = scalar_lea.vmem [#allocation3], %s990_s18  ;;  %s658_s23 = scalar_lea.vmem [#allocation2], %s990_s18 }
 0x1ef   : >> { %1050 = vmatprep.subr.bf16.mxu1 %v1375_v40  ;;  %1052 = vmatprep.mubr.msk.bf16.mxu1 %vm1376_vm3, %v1375_v40  ;;  %v659_v43 = vld [vmem:[%s658_s23] sm:$0xf]  ;;  %s664_s19 = scalar_lea.vmem [#allocation4], %s990_s18  ;;  %s775_s22 = scalar_lea.vmem [#allocation12], %s990_s18 }
 0x1f0   : >> { %v776_v54 = vld [vmem:[%s775_s22] sm:$0xf]  ;;  %s656_s17 = sadd.s32 1, %s1362_s17  }
 0x1f1   : >> { %v781_v56 = vsel %vm726_vm5, %v776_v54, 0  ;;  %p653_p10 = scmp.ge.s32.totalorder %s656_s17, 4  }
 0x1f2   : > { %v997_v10 = vld [vmem:[%s1764_s8] ss:$0 sm:$0xff] (%p653_p10)  ;;  %s999_s26 = sshll.u32 (%p653_p10), %s1449_s13, 7  ;;  %s1789_s29 = sld [smem:[#allocation21_spill]] (%p653_p10) }
 0x1f3   : >> { %v662_v41 = vld [vmem:[%s661_s30] sm:$0xf]  ;;  %s849_s18 = sshll.u32 (%p653_p10), %s1681_s15, 4  ;;  %s836_s17 = scalar_lea.sflag (%p653_p10), [#allocation8], %s1627_s9  ;;  %s1712_s18 = int_to_ptr.vmem [resolvable:$true] %s849_s18 }
 0x1f4   : >> { %v671_v42 = vsel %vm666_vm4, %v662_v41, 0  ;;  %v665_v49 = vld [vmem:[%s664_s19] sm:$0xf]  ;;  %s1280_s30 = scalar_lea.vmem (%p653_p10), %s1712_s18, 128  ;;  %s1377_s13 = smov (%p653_p10), [#allocation14]  }
 0x1f5   : >> { %1045 = vmatpush3.bf16.xpose.msra.mxu0 %v671_v42  ;;  %v728_v50 = vsel %vm726_vm5, %v665_v49, 0  ;;  %p1281_p3 = scmp.ne.s32.totalorder (%p653_p10), %s1712_s18, %s1280_s30  ;;  %s1284_s23 = sshll.u32 (%p653_p10), %s1377_s13, 4  ;;  %s1285_s23 = int_to_ptr.vmem [resolvable:$false] %s1284_s23 }
 0x1f6   : >> { %1051 = vmatpush3.bf16.msra.mxu1 %v728_v50  ;;  %s1286_s19 = scalar_lea.vmem (%p653_p10), %s1285_s23, 256  ;;  %p1287_p1 = scmp.lt.s32.totalorder (%p653_p10), %s1712_s18, %s1285_s23 }
 0x1f7   : >> { %1056 = vmatprep.subr.bf16.mxu1 %v1375_v40  ;;  %p1282_p7 = pnand (%p653_p10), %p1281_p3, %p1582_p5  ;;  %p1288_p2 = scmp.lt.s32.totalorder (%p653_p10), %s1286_s19, %s1280_s30 }
 0x1f8   : > { %s1709_s24 = scalar_lea.hbm (%p653_p10), %s1789_s29, %s999_s26 }
 0x1f9   : > { %p1283_p12 = pneg (%p653_p10), %p1282_p7  ;;  %p1289_p4 = por (%p653_p10), %p1288_p2, %p1287_p1 }
 0x1fb   : > { %p1290_p0 = pnand (%p653_p10), %p1289_p4, %p1283_p12 }
 0x1fc   : >> { %1047 = vmatmul.mubr.msk.bf16.vlgmr.msra.gmra.mrb[0].mxu0 %vm666_vm4, %v659_v43 }
 0x2cf   : >> { %v707_v44 = vpop.f32.mrb[0].mxu0 }
 0x2d0   : >> { %v1048_v45 = vpop.f32.mrb[1].mxu0  ;;  %v713_v46 = vsel %vm666_vm4, %v707_v44, -inf }
 0x2d1   : >> { %714 = vmax.xlane.f32.xlu0 %v713_v46  ;;  %v710_v47 = vpop.f32.mrb[2].mxu0 }
 0x2d2   : >> { %v1049_v48 = vpop.f32.mrb[3].mxu0 }
 0x35e   : >> { %v715_v51 = vpop.xlane.xlu0 %714 }
 0x35f   : >> { %v716_v52 = vsub.f32 %v707_v44, %v715_v51 }
 0x361   : >> { %v717_v53 = vmul.f32 1.442695, %v716_v52 }
 0x363   : >> { %1162 = vpow2.f32 %v717_v53 }
 0x36d   : >> { %v1163_v55 = vpop.eup %1162 }
 0x36e   : >> { %v719_v57 = vsel %vm666_vm4, %v1163_v55, 0.0  ;;  %v722_v58 = vpack.c.bf16 %v1163_v55, %v1163_v55 }
 0x36f   : >> { %720 = vadd.xlane.f32.xlu0 %v719_v57 }
 0x370   : >> { %1053 = vmatmul.mubr.msk.bf16.vlgmr.msra.gmra.mrb[0].mxu1 %vm666_vm4, %v722_v58 }
 0x371   : >> { %1057 = vmatpush3.bf16.msra.mxu1 %v781_v56  ;;  %1058 = vmatprep.mubr.msk.bf16.mxu1 %vm1376_vm3, %v1375_v40 }
 0x3fc   : >> { %v721_v59 = vpop.xlane.xlu0 %720 }
 0x3fd   : >> { %1164 = vrcp.f32 %v721_v59 }
 0x407   : >> { %v1165_v60 = vpop.eup %1164 }
 0x443   : >> { %v764_v61 = vpop.f32.mrb[0].mxu1 }
 0x444   : >> { %v771_v62 = vmul.f32 %v1165_v60, %v764_v61  ;;  %v1054_v63 = vpop.f32.mrb[1].mxu1 }
 0x445   : >> { %v767_v0 = vpop.f32.mrb[2].mxu1 }
 0x446   : >> { %v773_v1 = vpack.c.bf16 %v771_v62, %v771_v62  ;;  %v1055_v2 = vpop.f32.mrb[3].mxu1 }
 0x448   : >> { %1059 = vmatmul.mubr.msk.bf16.vlgmr.msra.gmra.mrb[4].mxu1 %vm666_vm4, %v773_v1 }
 0x518   : > { %655 = sbr.rel (!%p653_p10) target bundleno = 493 (0x1ed), region = 133 }
 0x51b   : >> { %v817_v4 = vpop.f32.mrb[4].mxu1 }
 0x51c   : >> { %v823_v5 = vadd.f32 %v817_v4, %v772_v3  ;;  %v1060_v6 = vpop.f32.mrb[5].mxu1 }
 0x51d   : >> { %v820_v7 = vpop.f32.mrb[6].mxu1 }
 0x51e   : >> { %824 = vst.msk [vmem:[#allocation5] sm:$0xff] %vm418_vm0, %v823_v5  ;;  %v1061_v8 = vpop.f32.mrb[7].mxu1 }
 0x525   : > { %v825_v9 = vld [vmem:[#allocation5] sm:$0xff] }
 0x526   : > { %v833_v11 = vadd.f32 %v997_v10, %v825_v9 }
 0x528   : > { %834 = vst.msk [vmem:[%s1681_s15] sm:$0xff] %vm418_vm0, %v833_v11 }
 0x529   : > { %1293 = shalt.err (!%p1290_p0)
}
 0x52a   : > { %s1294_s9 = scalar_lea.hbm %s1709_s24, 128  ;;  %s1298_s25 = scalar_lea.hbm %s1789_s29, 256 }
 0x52b   : > { %p1295_p9 = scmp.ne.s32.totalorder %s1709_s24, %s1294_s9  ;;  %p1299_p13 = scmp.lt.u32.totalorder %s1709_s24, %s1789_s29 }
 0x52c   : > { %p1300_p6 = scmp.lt.u32.totalorder %s1298_s25, %s1294_s9  ;;  %p1302_p3 = scmp.lt.u32.totalorder %s1294_s9, %s1709_s24 }
 0x52d   : > { %p1296_p11 = pnand %p1295_p9, %p1582_p5 }
 0x52e   : > { %p1301_p10 = por %p1300_p6, %p1299_p13 }
 0x52f   : > { %p1297_p8 = pneg %p1296_p11 }
 0x530   : > { %p1303_p7 = por %p1302_p3, %p1301_p10 }
 0x532   : > { %p1304_p12 = pnand %p1303_p7, %p1297_p8 }
 0x534   : > { %1307 = shalt.err (!%p1304_p12)
}
 0x535   : > { %1076 = dma.vmem_to_hbm [thread:$0]  (%p1582_p5), %s1712_s18, 128, %s1709_s24, %s836_s17  }
 0x536 PF: > { %s1790_s21 = sld [smem:[#allocation19_spill]]  ;;  %s1791_s20 = sld [smem:[#allocation20_spill]] }
 0x537   : > { %p1793_p2 = scmp.ge.s32.totalorder %s1358_s12, 2 }
 0x53c   : > { %s861_s30 = sand.u32 1, %s1790_s21   ;;  %p1792_p1 = scmp.ne.s32.totalorder %s1791_s20, 0 }
 0x53d   : > { %s862_s13 = scalar_lea.sflag [#allocation8], %s861_s30 }
 0x53e   : > { %p1093_p4 = pnand %p1793_p2, %p1792_p1 }
 0x540   : > { %1341 = dma.done.wait (!%p1093_p4), %s862_s13, 128  }
 0x541   : > { %1343 = vsyncadd (!%p1093_p4), %s862_s13, 4294967168  ;;  %p24_p0 = scmp.ge.s32.totalorder %s1568_s14, 4   ;;  %s1794_s30 = smov %s1350_s10 }
 0x542   : > { %s1795_s10 = smov %s1354_s11  ;;  %s1796_s11 = smov %s1578_s16 }
 0x543   : > { %s1797_s12 = smov %s1568_s14  ;;  %26 = sbr.rel (!%p24_p0) target bundleno = 9 (0x9), region = 144 }
 0x54a   :  { %867 = vsyncpa [#allocation7], 1 }
 0x54b   :  { %869 = vsyncpa [#allocation7 + $0x1], 1 }
 0x54c   :  { %870 = vsyncpa [#allocation10], 1 }
 0x54d   :  { %871 = vsyncpa [#allocation13], 1 }
 0x54e   :  { %872 = vsyncpa [#allocation8], 1 }
 0x54f   :  { %874 = vsyncpa [#allocation8 + $0x1], 1 }

</bundles_post_ra>
